<compile_context>
chip_gen: v6e
topology: v6e:2x2x1
jax: 0.10.0
libtpu: 0.0.40
codegen_flags: <defaults>
</compile_context>

<pallas_src>
import functools

import jax
import jax.numpy as jnp
from jax.experimental import pallas as pl
from jax.experimental.pallas import tpu as pltpu


# ----------------------------- Pallas kernel ------------------------------ #

def _treelstm_level_kernel(child_tbl_ref,                    # scalar prefetch (SMEM, flat 1-D)
                           xproj_ref,                        # (1, LT, 4Mp) per-level block
                           wh_ref, biouh_ref, bfh_ref,       # resident fused weights / biases
                           c_ref, h_ref,                     # outputs: VMEM-resident state
                           chb, ccb,                         # VMEM scratch gather buffers
                           *, mem_dim_p, level_tile, max_children):
    mp, lt, maxc = mem_dim_p, level_tile, max_children
    lvl = pl.program_id(0)

    @pl.when(lvl == 0)
    def _init():
        # Zero the whole state (incl. the sentinel row used by padded children).
        c_ref[...] = jnp.zeros_like(c_ref)
        h_ref[...] = jnp.zeros_like(h_ref)

    # ---- gather child states (slot-major): scratch row j*LT + r = child j of
    # ---- the node sitting in level slot r.  Padded entries point at the zero
    # ---- sentinel row, so no masking is ever needed.
    base = lvl * (maxc * lt)
    for j in range(maxc):
        for r in range(lt):
            p = child_tbl_ref[base + j * lt + r]
            dst = pl.ds(j * lt + r, 1)                       # static start
            chb[dst, :] = h_ref[pl.ds(p, 1), :]
            ccb[dst, :] = c_ref[pl.ds(p, 1), :]

    child_h = chb[...]                                       # (MAXC*LT, Mp)
    child_c = ccb[...]                                       # (MAXC*LT, Mp)

    # ---- one level-batched h projection on the MXU: (MAXC*LT, Mp) @ (Mp, 4Mp)
    child_proj = jnp.dot(child_h, wh_ref[...],
                         preferred_element_type=jnp.float32)  # (MAXC*LT, 4Mp)

    xp = xproj_ref[0]                                        # (LT, 4Mp): x@[W_ioux|W_fx]+b (hoisted)

    # iou-h contribution: by linearity sum_j (child_h_j @ W_iouh) == child_h_sum @ W_iouh
    iou_h = child_proj[0:lt, 0:3 * mp]
    for j in range(1, maxc):
        iou_h = iou_h + child_proj[j * lt:(j + 1) * lt, 0:3 * mp]
    iou = xp[:, 0:3 * mp] + iou_h + biouh_ref[...]           # (LT, 3Mp), lane-aligned slices

    i = jax.nn.sigmoid(iou[:, 0:mp])
    o = jax.nn.sigmoid(iou[:, mp:2 * mp])
    u = jnp.tanh(iou[:, 2 * mp:3 * mp])

    # f gates: sigmoid(fh(child_h_j) + fx(x)); padded child rows multiply c=0.
    fx = xp[:, 3 * mp:]
    fc = jnp.zeros((lt, mp), jnp.float32)
    for j in range(maxc):
        f_j = jax.nn.sigmoid(child_proj[j * lt:(j + 1) * lt, 3 * mp:]
                             + bfh_ref[...] + fx)
        fc = fc + f_j * child_c[j * lt:(j + 1) * lt, :]

    c = i * u + fc
    h = o * jnp.tanh(c)

    # Contiguous, 8-sublane-aligned, 128-lane-dense block store for the level.
    row0 = pl.multiple_of(lvl * lt, lt)
    c_ref[pl.ds(row0, lt), :] = c
    h_ref[pl.ds(row0, lt), :] = h


# ------------------------------- host glue -------------------------------- #

class Tree:
    def __init__(self, idx, children=()):
        self.idx = idx
        self.children = list(children)
        self.state = None


def init_params(key, in_dim, mem_dim):
    """PyTorch-Linear-style init; weights stored (in_features, out_features)."""
    def linear(k, fan_in, fan_out):
        k1, k2 = jax.random.split(k)
        bound = 1.0 / (fan_in ** 0.5)
        w = jax.random.uniform(k1, (fan_in, fan_out), jnp.float32, -bound, bound)
        b = jax.random.uniform(k2, (1, fan_out), jnp.float32, -bound, bound)
        return w, b

    ks = jax.random.split(key, 4)
    w_ioux, b_ioux = linear(ks[0], in_dim, 3 * mem_dim)
    w_iouh, b_iouh = linear(ks[1], mem_dim, 3 * mem_dim)
    w_fx, b_fx = linear(ks[2], in_dim, mem_dim)
    w_fh, b_fh = linear(ks[3], mem_dim, mem_dim)
    return dict(w_ioux=w_ioux, b_ioux=b_ioux, w_iouh=w_iouh, b_iouh=b_iouh,
                w_fx=w_fx, b_fx=b_fx, w_fh=w_fh, b_fh=b_fh)


def _round_up(x, m):
    return ((x + m - 1) // m) * m


def _pad_gates(w, m, mp):
    """Zero-pad every m-wide gate block of the last dim to mp lanes."""
    ngates = w.shape[-1] // m
    blocks = [jnp.pad(w[:, g * m:(g + 1) * m], ((0, 0), (0, mp - m)))
              for g in range(ngates)]
    return jnp.concatenate(blocks, axis=1)


def build_level_schedule(tree, max_children):
    """Group nodes by tree depth; build slot-major padded child-position table."""
    order = []

    def visit(node):
        depth = 0
        for ch in node.children:
            visit(ch)
            depth = max(depth, ch._depth + 1)
        assert len(node.children) <= max_children
        node._depth = depth
        order.append(node)

    visit(tree)

    num_levels = max(n._depth for n in order) + 1
    levels = [[] for _ in range(num_levels)]
    for n in order:
        levels[n._depth].append(n)

    level_tile = max(8, _round_up(max(len(l) for l in levels), 8))
    sentinel = num_levels * level_tile            # zero row, never written after init

    pos = {}                                      # node idx -> state row
    for l, lv in enumerate(levels):
        for r, n in enumerate(lv):
            pos[n.idx] = l * level_tile + r

    node_tbl = [[0] * level_tile for _ in range(num_levels)]
    # flat 1-D SMEM table (2-D SMEM tables pad their last dim to 128 words)
    child_tbl = [sentinel] * (num_levels * max_children * level_tile)
    for l, lv in enumerate(levels):
        for r, n in enumerate(lv):
            node_tbl[l][r] = n.idx
            for j, ch in enumerate(n.children):
                child_tbl[(l * max_children + j) * level_tile + r] = pos[ch.idx]

    visited = [n.idx for n in order]
    return (jnp.asarray(node_tbl, jnp.int32),
            jnp.asarray(child_tbl, jnp.int32),
            pos, num_levels, level_tile, visited)


def tree_lstm_forward(params, tree, inputs, conc, max_children):
    seq_len, in_dim = inputs.shape
    m = params["w_fh"].shape[0]
    mp = _round_up(m, 128)                         # lane-aligned mem_dim

    node_tbl, child_tbl, pos, num_levels, lt, visited = build_level_schedule(
        tree, max_children)

    # Fused, gate-wise zero-padded weights: padded lanes stay exactly 0.
    w_x = jnp.concatenate([_pad_gates(params["w_ioux"], m, mp),
                           jnp.pad(params["w_fx"], ((0, 0), (0, mp - m)))], axis=1)
    b_x = jnp.concatenate([_pad_gates(params["b_ioux"], m, mp),
                           jnp.pad(params["b_fx"], ((0, 0), (0, mp - m)))], axis=1)
    w_h = jnp.concatenate([_pad_gates(params["w_iouh"], m, mp),
                           jnp.pad(params["w_fh"], ((0, 0), (0, mp - m)))], axis=1)
    w_h = jnp.pad(w_h, ((0, mp - m), (0, 0)))                       # (Mp, 4Mp)
    b_iouh_p = _pad_gates(params["b_iouh"], m, mp)                  # (1, 3Mp)
    b_fh_p = jnp.pad(params["b_fh"], ((0, 0), (0, mp - m)))         # (1, Mp)

    # Hoisted, tree-independent x projection: ONE (seq, in) @ (in, 4Mp) matmul,
    # then gather the per-level / per-slot rows on the host (schedule is static).
    x_proj_all = (jnp.dot(inputs, w_x, precision=jax.lax.Precision.HIGHEST)
                  + b_x)                                            # (seq, 4Mp)
    xproj_lv = x_proj_all[node_tbl]                                 # (levels, LT, 4Mp)

    state_rows = num_levels * lt + 8               # +8 rows: zero read-sentinel block

    def resident(shape):
        zeros = (0,) * len(shape)
        return pl.BlockSpec(shape, lambda *_: zeros)   # DMA once, stay in VMEM

    kernel = functools.partial(_treelstm_level_kernel, mem_dim_p=mp,
                               level_tile=lt, max_children=max_children)

    # Explicit VMEM budget (v7x only has 64 MiB physical / 32 MiB scoped default).
    f32 = 4
    resident_bytes = (w_h.size + b_iouh_p.size + b_fh_p.size) * f32 \
        + 2 * state_rows * mp * f32
    stream_bytes = 2 * (lt * 4 * mp) * f32          # per-level xproj, double-buffered
    scratch_bytes = 2 * (max_children * lt * mp) * f32
    vmem_limit = min(int(2 * resident_bytes + stream_bytes + scratch_bytes
                         + (4 << 20)), 128 << 20)

    c_lv, h_lv = pl.pallas_call(
        kernel,
        out_shape=(jax.ShapeDtypeStruct((state_rows, mp), jnp.float32),
                   jax.ShapeDtypeStruct((state_rows, mp), jnp.float32)),
        grid_spec=pltpu.PrefetchScalarGridSpec(
            num_scalar_prefetch=1,
            grid=(num_levels,),
            in_specs=[pl.BlockSpec((1, lt, 4 * mp), lambda l, tbl: (l, 0, 0)),
                      resident(w_h.shape),
                      resident(b_iouh_p.shape),
                      resident(b_fh_p.shape)],
            # c/h MUST keep constant index_maps (fully resident) so later levels
            # can gather child rows written by earlier levels.
            out_specs=(resident((state_rows, mp)),
                       resident((state_rows, mp))),
            scratch_shapes=[pltpu.VMEM((max_children * lt, mp), jnp.float32),
                            pltpu.VMEM((max_children * lt, mp), jnp.float32)]),
        compiler_params=pltpu.CompilerParams(
            dimension_semantics=("arbitrary",),     # levels are sequentially dependent
            vmem_limit_bytes=vmem_limit),
    )(child_tbl, xproj_lv, w_h, b_iouh_p, b_fh_p)

    # Host-side epilogue: crop padding, scatter back to node order, build conc.
    visited_idx = jnp.asarray(visited, jnp.int32)
    rows = jnp.asarray([pos[i] for i in visited], jnp.int32)
    c_nodes = c_lv[rows, :m]
    h_nodes = h_lv[rows, :m]
    conc = conc.at[visited_idx].set(
        jnp.concatenate([inputs[visited_idx], c_nodes], axis=1))
    c_all = jnp.zeros((seq_len, m), jnp.float32).at[visited_idx].set(c_nodes)
    h_all = jnp.zeros((seq_len, m), jnp.float32).at[visited_idx].set(h_nodes)
    return conc, c_all, h_all


# ----------------------- pure-JAX reference (for check) -------------------- #

def _ref_node(params, x, child_c, child_h):
    hp = jax.lax.Precision.HIGHEST
    m = params["w_fh"].shape[0]
    child_h_sum = jnp.sum(child_h, axis=0, keepdims=True)
    iou = (jnp.dot(x, params["w_ioux"], precision=hp) + params["b_ioux"]
           + jnp.dot(child_h_sum, params["w_iouh"], precision=hp) + params["b_iouh"])
    i = jax.nn.sigmoid(iou[:, :m])
    o = jax.nn.sigmoid(iou[:, m:2 * m])
    u = jnp.tanh(iou[:, 2 * m:])
    f = jax.nn.sigmoid(jnp.dot(child_h, params["w_fh"], precision=hp) + params["b_fh"]
                       + jnp.dot(x, params["w_fx"], precision=hp) + params["b_fx"])
    c = i * u + jnp.sum(f * child_c, axis=0, keepdims=True)
    h = o * jnp.tanh(c)
    return c, h


def _ref_forward(params, tree, inputs, conc):
    m = params["w_fh"].shape[0]
    for ch in tree.children:
        conc = _ref_forward(params, ch, inputs, conc)
    if not tree.children:
        child_c = jnp.zeros((1, m), jnp.float32)
        child_h = jnp.zeros((1, m), jnp.float32)
    else:
        child_c = jnp.concatenate([ch.state[0] for ch in tree.children], axis=0)
        child_h = jnp.concatenate([ch.state[1] for ch in tree.children], axis=0)
    x = inputs[tree.idx][None, :]
    c, h = _ref_node(params, x, child_c, child_h)
    tree.state = (c, h)
    conc = conc.at[tree.idx].set(jnp.concatenate([inputs[tree.idx], c[0]], axis=0))
    return conc


# --------------------------------- main ------------------------------------ #

if __name__ == "__main__":
    IN_DIM, MEM_DIM, SEQ_LEN, MAX_CHILDREN = 16, 32, 8, 4

    key = jax.random.PRNGKey(0)
    k_param, k_in = jax.random.split(key)
    params = init_params(k_param, IN_DIM, MEM_DIM)
    inputs = jax.random.normal(k_in, (SEQ_LEN, IN_DIM), jnp.float32)

    def make_tree():
        return Tree(3, [Tree(1, [Tree(0), Tree(2)]),
                        Tree(5, [Tree(4), Tree(6), Tree(7)])])

    conc0 = jnp.zeros((SEQ_LEN, IN_DIM + MEM_DIM), jnp.float32)

    conc, c_all, h_all = tree_lstm_forward(params, make_tree(), inputs, conc0,
                                           MAX_CHILDREN)
    jax.block_until_ready((conc, c_all, h_all))

    # correctness check against a plain-JAX recursive reference
    ref_tree = make_tree()
    conc_ref = _ref_forward(params, ref_tree, inputs, conc0)
    c_root_ref, h_root_ref = ref_tree.state
    root = 3
    assert jnp.allclose(conc, conc_ref, atol=1e-3, rtol=1e-3)
    assert jnp.allclose(c_all[root], c_root_ref[0], atol=1e-3, rtol=1e-3)
    assert jnp.allclose(h_all[root], h_root_ref[0], atol=1e-3, rtol=1e-3)

    print("KERNEL_OK")
</pallas_src>

<mosaic_0001>
module attributes {stable_mosaic.version = 11 : i64} {
  func.func @_treelstm_level_kernel(%arg0: i32, %arg1: memref<96xi32, #tpu.memory_space<smem>>, %arg2: memref<1x8x512xf32, #tpu.memory_space<vmem>>, %arg3: memref<128x512xf32, #tpu.memory_space<vmem>>, %arg4: memref<1x384xf32, #tpu.memory_space<vmem>>, %arg5: memref<1x128xf32, #tpu.memory_space<vmem>>, %arg6: memref<32x128xf32, #tpu.memory_space<vmem>>, %arg7: memref<32x128xf32, #tpu.memory_space<vmem>>, %arg8: memref<32x128xf32, #tpu.memory_space<vmem>>, %arg9: memref<32x128xf32, #tpu.memory_space<vmem>>) attributes {dimension_semantics = [#tpu.dimension_semantics<arbitrary>], iteration_bounds = array<i64: 3>, scalar_prefetch = 1 : i64, scratch_operands = 2 : i64, tpu.core_type = #tpu.core_type<tc>, window_params = [{transform_indices = @transform_0, window_bounds = array<i64: 1, 8, 512>}, {pipeline_mode = #tpu.pipeline_mode<synchronous>, transform_indices = @transform_1, window_bounds = array<i64: 128, 512>}, {pipeline_mode = #tpu.pipeline_mode<synchronous>, transform_indices = @transform_2, window_bounds = array<i64: 1, 384>}, {pipeline_mode = #tpu.pipeline_mode<synchronous>, transform_indices = @transform_3, window_bounds = array<i64: 1, 128>}, {pipeline_mode = #tpu.pipeline_mode<synchronous>, transform_indices = @transform_4, window_bounds = array<i64: 32, 128>}, {pipeline_mode = #tpu.pipeline_mode<synchronous>, transform_indices = @transform_5, window_bounds = array<i64: 32, 128>}]} {
    %c0_i32 = arith.constant 0 : i32
    %0 = arith.cmpi eq, %arg0, %c0_i32 : i32
    %1 = arith.extui %0 : i1 to i32
    %c0_i32_0 = arith.constant 0 : i32
    %2 = arith.cmpi ne, %1, %c0_i32_0 : i32
    scf.if %2 {
      %cst_244 = arith.constant 0.000000e+00 : f32
      %420 = vector.broadcast %cst_244 : f32 to vector<32x128xf32>
      %c0_245 = arith.constant 0 : index
      %c0_246 = arith.constant 0 : index
      %421 = vector.load %arg6[%c0_245, %c0_246] : memref<32x128xf32, #tpu.memory_space<vmem>>, vector<32x128xf32>
      tpu.vector_store %arg6[%c0_245, %c0_246], %420 {strides = array<i32>} : memref<32x128xf32, #tpu.memory_space<vmem>>, vector<32x128xf32>,
      %cst_247 = arith.constant 0.000000e+00 : f32
      %422 = vector.broadcast %cst_247 : f32 to vector<32x128xf32>
      %c0_248 = arith.constant 0 : index
      %c0_249 = arith.constant 0 : index
      %423 = vector.load %arg7[%c0_248, %c0_249] : memref<32x128xf32, #tpu.memory_space<vmem>>, vector<32x128xf32>
      tpu.vector_store %arg7[%c0_248, %c0_249], %422 {strides = array<i32>} : memref<32x128xf32, #tpu.memory_space<vmem>>, vector<32x128xf32>,
    } else {
    }
    %c32_i32 = arith.constant 32 : i32
    %3 = arith.muli %arg0, %c32_i32 : i32
    %c0_i32_1 = arith.constant 0 : i32
    %4 = arith.addi %3, %c0_i32_1 : i32
    %c0_i32_2 = arith.constant 0 : i32
    %5 = arith.addi %4, %c0_i32_2 : i32
    %6 = arith.index_cast %5 : i32 to index
    %7 = memref.load %arg1[%6] : memref<96xi32, #tpu.memory_space<smem>>
    %8 = arith.index_cast %7 : i32 to index
    %c0 = arith.constant 0 : index
    %9 = vector.load %arg7[%8, %c0] : memref<32x128xf32, #tpu.memory_space<vmem>>, vector<1x128xf32>
    %c0_3 = arith.constant 0 : index
    %c0_4 = arith.constant 0 : index
    %10 = vector.load %arg8[%c0_3, %c0_4] : memref<32x128xf32, #tpu.memory_space<vmem>>, vector<1x128xf32>
    tpu.vector_store %arg8[%c0_3, %c0_4], %9 {strides = array<i32>} : memref<32x128xf32, #tpu.memory_space<vmem>>, vector<1x128xf32>,
    %11 = arith.index_cast %7 : i32 to index
    %c0_5 = arith.constant 0 : index
    %12 = vector.load %arg6[%11, %c0_5] : memref<32x128xf32, #tpu.memory_space<vmem>>, vector<1x128xf32>
    %c0_6 = arith.constant 0 : index
    %c0_7 = arith.constant 0 : index
    %13 = vector.load %arg9[%c0_6, %c0_7] : memref<32x128xf32, #tpu.memory_space<vmem>>, vector<1x128xf32>
    tpu.vector_store %arg9[%c0_6, %c0_7], %12 {strides = array<i32>} : memref<32x128xf32, #tpu.memory_space<vmem>>, vector<1x128xf32>,
    %c0_i32_8 = arith.constant 0 : i32
    %14 = arith.addi %3, %c0_i32_8 : i32
    %c1_i32 = arith.constant 1 : i32
    %15 = arith.addi %14, %c1_i32 : i32
    %16 = arith.index_cast %15 : i32 to index
    %17 = memref.load %arg1[%16] : memref<96xi32, #tpu.memory_space<smem>>
    %18 = arith.index_cast %17 : i32 to index
    %c0_9 = arith.constant 0 : index
    %19 = vector.load %arg7[%18, %c0_9] : memref<32x128xf32, #tpu.memory_space<vmem>>, vector<1x128xf32>
    %c1 = arith.constant 1 : index
    %c0_10 = arith.constant 0 : index
    %20 = vector.load %arg8[%c1, %c0_10] : memref<32x128xf32, #tpu.memory_space<vmem>>, vector<1x128xf32>
    tpu.vector_store %arg8[%c1, %c0_10], %19 {strides = array<i32>} : memref<32x128xf32, #tpu.memory_space<vmem>>, vector<1x128xf32>,
    %21 = arith.index_cast %17 : i32 to index
    %c0_11 = arith.constant 0 : index
    %22 = vector.load %arg6[%21, %c0_11] : memref<32x128xf32, #tpu.memory_space<vmem>>, vector<1x128xf32>
    %c1_12 = arith.constant 1 : index
    %c0_13 = arith.constant 0 : index
    %23 = vector.load %arg9[%c1_12, %c0_13] : memref<32x128xf32, #tpu.memory_space<vmem>>, vector<1x128xf32>
    tpu.vector_store %arg9[%c1_12, %c0_13], %22 {strides = array<i32>} : memref<32x128xf32, #tpu.memory_space<vmem>>, vector<1x128xf32>,
    %c0_i32_14 = arith.constant 0 : i32
    %24 = arith.addi %3, %c0_i32_14 : i32
    %c2_i32 = arith.constant 2 : i32
    %25 = arith.addi %24, %c2_i32 : i32
    %26 = arith.index_cast %25 : i32 to index
    %27 = memref.load %arg1[%26] : memref<96xi32, #tpu.memory_space<smem>>
    %28 = arith.index_cast %27 : i32 to index
    %c0_15 = arith.constant 0 : index
    %29 = vector.load %arg7[%28, %c0_15] : memref<32x128xf32, #tpu.memory_space<vmem>>, vector<1x128xf32>
    %c2 = arith.constant 2 : index
    %c0_16 = arith.constant 0 : index
    %30 = vector.load %arg8[%c2, %c0_16] : memref<32x128xf32, #tpu.memory_space<vmem>>, vector<1x128xf32>
    tpu.vector_store %arg8[%c2, %c0_16], %29 {strides = array<i32>} : memref<32x128xf32, #tpu.memory_space<vmem>>, vector<1x128xf32>,
    %31 = arith.index_cast %27 : i32 to index
    %c0_17 = arith.constant 0 : index
    %32 = vector.load %arg6[%31, %c0_17] : memref<32x128xf32, #tpu.memory_space<vmem>>, vector<1x128xf32>
    %c2_18 = arith.constant 2 : index
    %c0_19 = arith.constant 0 : index
    %33 = vector.load %arg9[%c2_18, %c0_19] : memref<32x128xf32, #tpu.memory_space<vmem>>, vector<1x128xf32>
    tpu.vector_store %arg9[%c2_18, %c0_19], %32 {strides = array<i32>} : memref<32x128xf32, #tpu.memory_space<vmem>>, vector<1x128xf32>,
    %c0_i32_20 = arith.constant 0 : i32
    %34 = arith.addi %3, %c0_i32_20 : i32
    %c3_i32 = arith.constant 3 : i32
    %35 = arith.addi %34, %c3_i32 : i32
    %36 = arith.index_cast %35 : i32 to index
    %37 = memref.load %arg1[%36] : memref<96xi32, #tpu.memory_space<smem>>
    %38 = arith.index_cast %37 : i32 to index
    %c0_21 = arith.constant 0 : index
    %39 = vector.load %arg7[%38, %c0_21] : memref<32x128xf32, #tpu.memory_space<vmem>>, vector<1x128xf32>
    %c3 = arith.constant 3 : index
    %c0_22 = arith.constant 0 : index
    %40 = vector.load %arg8[%c3, %c0_22] : memref<32x128xf32, #tpu.memory_space<vmem>>, vector<1x128xf32>
    tpu.vector_store %arg8[%c3, %c0_22], %39 {strides = array<i32>} : memref<32x128xf32, #tpu.memory_space<vmem>>, vector<1x128xf32>,
    %41 = arith.index_cast %37 : i32 to index
    %c0_23 = arith.constant 0 : index
    %42 = vector.load %arg6[%41, %c0_23] : memref<32x128xf32, #tpu.memory_space<vmem>>, vector<1x128xf32>
    %c3_24 = arith.constant 3 : index
    %c0_25 = arith.constant 0 : index
    %43 = vector.load %arg9[%c3_24, %c0_25] : memref<32x128xf32, #tpu.memory_space<vmem>>, vector<1x128xf32>
    tpu.vector_store %arg9[%c3_24, %c0_25], %42 {strides = array<i32>} : memref<32x128xf32, #tpu.memory_space<vmem>>, vector<1x128xf32>,
    %c0_i32_26 = arith.constant 0 : i32
    %44 = arith.addi %3, %c0_i32_26 : i32
    %c4_i32 = arith.constant 4 : i32
    %45 = arith.addi %44, %c4_i32 : i32
    %46 = arith.index_cast %45 : i32 to index
    %47 = memref.load %arg1[%46] : memref<96xi32, #tpu.memory_space<smem>>
    %48 = arith.index_cast %47 : i32 to index
    %c0_27 = arith.constant 0 : index
    %49 = vector.load %arg7[%48, %c0_27] : memref<32x128xf32, #tpu.memory_space<vmem>>, vector<1x128xf32>
    %c4 = arith.constant 4 : index
    %c0_28 = arith.constant 0 : index
    %50 = vector.load %arg8[%c4, %c0_28] : memref<32x128xf32, #tpu.memory_space<vmem>>, vector<1x128xf32>
    tpu.vector_store %arg8[%c4, %c0_28], %49 {strides = array<i32>} : memref<32x128xf32, #tpu.memory_space<vmem>>, vector<1x128xf32>,
    %51 = arith.index_cast %47 : i32 to index
    %c0_29 = arith.constant 0 : index
    %52 = vector.load %arg6[%51, %c0_29] : memref<32x128xf32, #tpu.memory_space<vmem>>, vector<1x128xf32>
    %c4_30 = arith.constant 4 : index
    %c0_31 = arith.constant 0 : index
    %53 = vector.load %arg9[%c4_30, %c0_31] : memref<32x128xf32, #tpu.memory_space<vmem>>, vector<1x128xf32>
    tpu.vector_store %arg9[%c4_30, %c0_31], %52 {strides = array<i32>} : memref<32x128xf32, #tpu.memory_space<vmem>>, vector<1x128xf32>,
    %c0_i32_32 = arith.constant 0 : i32
    %54 = arith.addi %3, %c0_i32_32 : i32
    %c5_i32 = arith.constant 5 : i32
    %55 = arith.addi %54, %c5_i32 : i32
    %56 = arith.index_cast %55 : i32 to index
    %57 = memref.load %arg1[%56] : memref<96xi32, #tpu.memory_space<smem>>
    %58 = arith.index_cast %57 : i32 to index
    %c0_33 = arith.constant 0 : index
    %59 = vector.load %arg7[%58, %c0_33] : memref<32x128xf32, #tpu.memory_space<vmem>>, vector<1x128xf32>
    %c5 = arith.constant 5 : index
    %c0_34 = arith.constant 0 : index
    %60 = vector.load %arg8[%c5, %c0_34] : memref<32x128xf32, #tpu.memory_space<vmem>>, vector<1x128xf32>
    tpu.vector_store %arg8[%c5, %c0_34], %59 {strides = array<i32>} : memref<32x128xf32, #tpu.memory_space<vmem>>, vector<1x128xf32>,
    %61 = arith.index_cast %57 : i32 to index
    %c0_35 = arith.constant 0 : index
    %62 = vector.load %arg6[%61, %c0_35] : memref<32x128xf32, #tpu.memory_space<vmem>>, vector<1x128xf32>
    %c5_36 = arith.constant 5 : index
    %c0_37 = arith.constant 0 : index
    %63 = vector.load %arg9[%c5_36, %c0_37] : memref<32x128xf32, #tpu.memory_space<vmem>>, vector<1x128xf32>
    tpu.vector_store %arg9[%c5_36, %c0_37], %62 {strides = array<i32>} : memref<32x128xf32, #tpu.memory_space<vmem>>, vector<1x128xf32>,
    %c0_i32_38 = arith.constant 0 : i32
    %64 = arith.addi %3, %c0_i32_38 : i32
    %c6_i32 = arith.constant 6 : i32
    %65 = arith.addi %64, %c6_i32 : i32
    %66 = arith.index_cast %65 : i32 to index
    %67 = memref.load %arg1[%66] : memref<96xi32, #tpu.memory_space<smem>>
    %68 = arith.index_cast %67 : i32 to index
    %c0_39 = arith.constant 0 : index
    %69 = vector.load %arg7[%68, %c0_39] : memref<32x128xf32, #tpu.memory_space<vmem>>, vector<1x128xf32>
    %c6 = arith.constant 6 : index
    %c0_40 = arith.constant 0 : index
    %70 = vector.load %arg8[%c6, %c0_40] : memref<32x128xf32, #tpu.memory_space<vmem>>, vector<1x128xf32>
    tpu.vector_store %arg8[%c6, %c0_40], %69 {strides = array<i32>} : memref<32x128xf32, #tpu.memory_space<vmem>>, vector<1x128xf32>,
    %71 = arith.index_cast %67 : i32 to index
    %c0_41 = arith.constant 0 : index
    %72 = vector.load %arg6[%71, %c0_41] : memref<32x128xf32, #tpu.memory_space<vmem>>, vector<1x128xf32>
    %c6_42 = arith.constant 6 : index
    %c0_43 = arith.constant 0 : index
    %73 = vector.load %arg9[%c6_42, %c0_43] : memref<32x128xf32, #tpu.memory_space<vmem>>, vector<1x128xf32>
    tpu.vector_store %arg9[%c6_42, %c0_43], %72 {strides = array<i32>} : memref<32x128xf32, #tpu.memory_space<vmem>>, vector<1x128xf32>,
    %c0_i32_44 = arith.constant 0 : i32
    %74 = arith.addi %3, %c0_i32_44 : i32
    %c7_i32 = arith.constant 7 : i32
    %75 = arith.addi %74, %c7_i32 : i32
    %76 = arith.index_cast %75 : i32 to index
    %77 = memref.load %arg1[%76] : memref<96xi32, #tpu.memory_space<smem>>
    %78 = arith.index_cast %77 : i32 to index
    %c0_45 = arith.constant 0 : index
    %79 = vector.load %arg7[%78, %c0_45] : memref<32x128xf32, #tpu.memory_space<vmem>>, vector<1x128xf32>
    %c7 = arith.constant 7 : index
    %c0_46 = arith.constant 0 : index
    %80 = vector.load %arg8[%c7, %c0_46] : memref<32x128xf32, #tpu.memory_space<vmem>>, vector<1x128xf32>
    tpu.vector_store %arg8[%c7, %c0_46], %79 {strides = array<i32>} : memref<32x128xf32, #tpu.memory_space<vmem>>, vector<1x128xf32>,
    %81 = arith.index_cast %77 : i32 to index
    %c0_47 = arith.constant 0 : index
    %82 = vector.load %arg6[%81, %c0_47] : memref<32x128xf32, #tpu.memory_space<vmem>>, vector<1x128xf32>
    %c7_48 = arith.constant 7 : index
    %c0_49 = arith.constant 0 : index
    %83 = vector.load %arg9[%c7_48, %c0_49] : memref<32x128xf32, #tpu.memory_space<vmem>>, vector<1x128xf32>
    tpu.vector_store %arg9[%c7_48, %c0_49], %82 {strides = array<i32>} : memref<32x128xf32, #tpu.memory_space<vmem>>, vector<1x128xf32>,
    %c8_i32 = arith.constant 8 : i32
    %84 = arith.addi %3, %c8_i32 : i32
    %c0_i32_50 = arith.constant 0 : i32
    %85 = arith.addi %84, %c0_i32_50 : i32
    %86 = arith.index_cast %85 : i32 to index
    %87 = memref.load %arg1[%86] : memref<96xi32, #tpu.memory_space<smem>>
    %88 = arith.index_cast %87 : i32 to index
    %c0_51 = arith.constant 0 : index
    %89 = vector.load %arg7[%88, %c0_51] : memref<32x128xf32, #tpu.memory_space<vmem>>, vector<1x128xf32>
    %c8 = arith.constant 8 : index
    %c0_52 = arith.constant 0 : index
    %90 = vector.load %arg8[%c8, %c0_52] : memref<32x128xf32, #tpu.memory_space<vmem>>, vector<1x128xf32>
    tpu.vector_store %arg8[%c8, %c0_52], %89 {strides = array<i32>} : memref<32x128xf32, #tpu.memory_space<vmem>>, vector<1x128xf32>,
    %91 = arith.index_cast %87 : i32 to index
    %c0_53 = arith.constant 0 : index
    %92 = vector.load %arg6[%91, %c0_53] : memref<32x128xf32, #tpu.memory_space<vmem>>, vector<1x128xf32>
    %c8_54 = arith.constant 8 : index
    %c0_55 = arith.constant 0 : index
    %93 = vector.load %arg9[%c8_54, %c0_55] : memref<32x128xf32, #tpu.memory_space<vmem>>, vector<1x128xf32>
    tpu.vector_store %arg9[%c8_54, %c0_55], %92 {strides = array<i32>} : memref<32x128xf32, #tpu.memory_space<vmem>>, vector<1x128xf32>,
    %c8_i32_56 = arith.constant 8 : i32
    %94 = arith.addi %3, %c8_i32_56 : i32
    %c1_i32_57 = arith.constant 1 : i32
    %95 = arith.addi %94, %c1_i32_57 : i32
    %96 = arith.index_cast %95 : i32 to index
    %97 = memref.load %arg1[%96] : memref<96xi32, #tpu.memory_space<smem>>
    %98 = arith.index_cast %97 : i32 to index
    %c0_58 = arith.constant 0 : index
    %99 = vector.load %arg7[%98, %c0_58] : memref<32x128xf32, #tpu.memory_space<vmem>>, vector<1x128xf32>
    %c9 = arith.constant 9 : index
    %c0_59 = arith.constant 0 : index
    %100 = vector.load %arg8[%c9, %c0_59] : memref<32x128xf32, #tpu.memory_space<vmem>>, vector<1x128xf32>
    tpu.vector_store %arg8[%c9, %c0_59], %99 {strides = array<i32>} : memref<32x128xf32, #tpu.memory_space<vmem>>, vector<1x128xf32>,
    %101 = arith.index_cast %97 : i32 to index
    %c0_60 = arith.constant 0 : index
    %102 = vector.load %arg6[%101, %c0_60] : memref<32x128xf32, #tpu.memory_space<vmem>>, vector<1x128xf32>
    %c9_61 = arith.constant 9 : index
    %c0_62 = arith.constant 0 : index
    %103 = vector.load %arg9[%c9_61, %c0_62] : memref<32x128xf32, #tpu.memory_space<vmem>>, vector<1x128xf32>
    tpu.vector_store %arg9[%c9_61, %c0_62], %102 {strides = array<i32>} : memref<32x128xf32, #tpu.memory_space<vmem>>, vector<1x128xf32>,
    %c8_i32_63 = arith.constant 8 : i32
    %104 = arith.addi %3, %c8_i32_63 : i32
    %c2_i32_64 = arith.constant 2 : i32
    %105 = arith.addi %104, %c2_i32_64 : i32
    %106 = arith.index_cast %105 : i32 to index
    %107 = memref.load %arg1[%106] : memref<96xi32, #tpu.memory_space<smem>>
    %108 = arith.index_cast %107 : i32 to index
    %c0_65 = arith.constant 0 : index
    %109 = vector.load %arg7[%108, %c0_65] : memref<32x128xf32, #tpu.memory_space<vmem>>, vector<1x128xf32>
    %c10 = arith.constant 10 : index
    %c0_66 = arith.constant 0 : index
    %110 = vector.load %arg8[%c10, %c0_66] : memref<32x128xf32, #tpu.memory_space<vmem>>, vector<1x128xf32>
    tpu.vector_store %arg8[%c10, %c0_66], %109 {strides = array<i32>} : memref<32x128xf32, #tpu.memory_space<vmem>>, vector<1x128xf32>,
    %111 = arith.index_cast %107 : i32 to index
    %c0_67 = arith.constant 0 : index
    %112 = vector.load %arg6[%111, %c0_67] : memref<32x128xf32, #tpu.memory_space<vmem>>, vector<1x128xf32>
    %c10_68 = arith.constant 10 : index
    %c0_69 = arith.constant 0 : index
    %113 = vector.load %arg9[%c10_68, %c0_69] : memref<32x128xf32, #tpu.memory_space<vmem>>, vector<1x128xf32>
    tpu.vector_store %arg9[%c10_68, %c0_69], %112 {strides = array<i32>} : memref<32x128xf32, #tpu.memory_space<vmem>>, vector<1x128xf32>,
    %c8_i32_70 = arith.constant 8 : i32
    %114 = arith.addi %3, %c8_i32_70 : i32
    %c3_i32_71 = arith.constant 3 : i32
    %115 = arith.addi %114, %c3_i32_71 : i32
    %116 = arith.index_cast %115 : i32 to index
    %117 = memref.load %arg1[%116] : memref<96xi32, #tpu.memory_space<smem>>
    %118 = arith.index_cast %117 : i32 to index
    %c0_72 = arith.constant 0 : index
    %119 = vector.load %arg7[%118, %c0_72] : memref<32x128xf32, #tpu.memory_space<vmem>>, vector<1x128xf32>
    %c11 = arith.constant 11 : index
    %c0_73 = arith.constant 0 : index
    %120 = vector.load %arg8[%c11, %c0_73] : memref<32x128xf32, #tpu.memory_space<vmem>>, vector<1x128xf32>
    tpu.vector_store %arg8[%c11, %c0_73], %119 {strides = array<i32>} : memref<32x128xf32, #tpu.memory_space<vmem>>, vector<1x128xf32>,
    %121 = arith.index_cast %117 : i32 to index
    %c0_74 = arith.constant 0 : index
    %122 = vector.load %arg6[%121, %c0_74] : memref<32x128xf32, #tpu.memory_space<vmem>>, vector<1x128xf32>
    %c11_75 = arith.constant 11 : index
    %c0_76 = arith.constant 0 : index
    %123 = vector.load %arg9[%c11_75, %c0_76] : memref<32x128xf32, #tpu.memory_space<vmem>>, vector<1x128xf32>
    tpu.vector_store %arg9[%c11_75, %c0_76], %122 {strides = array<i32>} : memref<32x128xf32, #tpu.memory_space<vmem>>, vector<1x128xf32>,
    %c8_i32_77 = arith.constant 8 : i32
    %124 = arith.addi %3, %c8_i32_77 : i32
    %c4_i32_78 = arith.constant 4 : i32
    %125 = arith.addi %124, %c4_i32_78 : i32
    %126 = arith.index_cast %125 : i32 to index
    %127 = memref.load %arg1[%126] : memref<96xi32, #tpu.memory_space<smem>>
    %128 = arith.index_cast %127 : i32 to index
    %c0_79 = arith.constant 0 : index
    %129 = vector.load %arg7[%128, %c0_79] : memref<32x128xf32, #tpu.memory_space<vmem>>, vector<1x128xf32>
    %c12 = arith.constant 12 : index
    %c0_80 = arith.constant 0 : index
    %130 = vector.load %arg8[%c12, %c0_80] : memref<32x128xf32, #tpu.memory_space<vmem>>, vector<1x128xf32>
    tpu.vector_store %arg8[%c12, %c0_80], %129 {strides = array<i32>} : memref<32x128xf32, #tpu.memory_space<vmem>>, vector<1x128xf32>,
    %131 = arith.index_cast %127 : i32 to index
    %c0_81 = arith.constant 0 : index
    %132 = vector.load %arg6[%131, %c0_81] : memref<32x128xf32, #tpu.memory_space<vmem>>, vector<1x128xf32>
    %c12_82 = arith.constant 12 : index
    %c0_83 = arith.constant 0 : index
    %133 = vector.load %arg9[%c12_82, %c0_83] : memref<32x128xf32, #tpu.memory_space<vmem>>, vector<1x128xf32>
    tpu.vector_store %arg9[%c12_82, %c0_83], %132 {strides = array<i32>} : memref<32x128xf32, #tpu.memory_space<vmem>>, vector<1x128xf32>,
    %c8_i32_84 = arith.constant 8 : i32
    %134 = arith.addi %3, %c8_i32_84 : i32
    %c5_i32_85 = arith.constant 5 : i32
    %135 = arith.addi %134, %c5_i32_85 : i32
    %136 = arith.index_cast %135 : i32 to index
    %137 = memref.load %arg1[%136] : memref<96xi32, #tpu.memory_space<smem>>
    %138 = arith.index_cast %137 : i32 to index
    %c0_86 = arith.constant 0 : index
    %139 = vector.load %arg7[%138, %c0_86] : memref<32x128xf32, #tpu.memory_space<vmem>>, vector<1x128xf32>
    %c13 = arith.constant 13 : index
    %c0_87 = arith.constant 0 : index
    %140 = vector.load %arg8[%c13, %c0_87] : memref<32x128xf32, #tpu.memory_space<vmem>>, vector<1x128xf32>
    tpu.vector_store %arg8[%c13, %c0_87], %139 {strides = array<i32>} : memref<32x128xf32, #tpu.memory_space<vmem>>, vector<1x128xf32>,
    %141 = arith.index_cast %137 : i32 to index
    %c0_88 = arith.constant 0 : index
    %142 = vector.load %arg6[%141, %c0_88] : memref<32x128xf32, #tpu.memory_space<vmem>>, vector<1x128xf32>
    %c13_89 = arith.constant 13 : index
    %c0_90 = arith.constant 0 : index
    %143 = vector.load %arg9[%c13_89, %c0_90] : memref<32x128xf32, #tpu.memory_space<vmem>>, vector<1x128xf32>
    tpu.vector_store %arg9[%c13_89, %c0_90], %142 {strides = array<i32>} : memref<32x128xf32, #tpu.memory_space<vmem>>, vector<1x128xf32>,
    %c8_i32_91 = arith.constant 8 : i32
    %144 = arith.addi %3, %c8_i32_91 : i32
    %c6_i32_92 = arith.constant 6 : i32
    %145 = arith.addi %144, %c6_i32_92 : i32
    %146 = arith.index_cast %145 : i32 to index
    %147 = memref.load %arg1[%146] : memref<96xi32, #tpu.memory_space<smem>>
    %148 = arith.index_cast %147 : i32 to index
    %c0_93 = arith.constant 0 : index
    %149 = vector.load %arg7[%148, %c0_93] : memref<32x128xf32, #tpu.memory_space<vmem>>, vector<1x128xf32>
    %c14 = arith.constant 14 : index
    %c0_94 = arith.constant 0 : index
    %150 = vector.load %arg8[%c14, %c0_94] : memref<32x128xf32, #tpu.memory_space<vmem>>, vector<1x128xf32>
    tpu.vector_store %arg8[%c14, %c0_94], %149 {strides = array<i32>} : memref<32x128xf32, #tpu.memory_space<vmem>>, vector<1x128xf32>,
    %151 = arith.index_cast %147 : i32 to index
    %c0_95 = arith.constant 0 : index
    %152 = vector.load %arg6[%151, %c0_95] : memref<32x128xf32, #tpu.memory_space<vmem>>, vector<1x128xf32>
    %c14_96 = arith.constant 14 : index
    %c0_97 = arith.constant 0 : index
    %153 = vector.load %arg9[%c14_96, %c0_97] : memref<32x128xf32, #tpu.memory_space<vmem>>, vector<1x128xf32>
    tpu.vector_store %arg9[%c14_96, %c0_97], %152 {strides = array<i32>} : memref<32x128xf32, #tpu.memory_space<vmem>>, vector<1x128xf32>,
    %c8_i32_98 = arith.constant 8 : i32
    %154 = arith.addi %3, %c8_i32_98 : i32
    %c7_i32_99 = arith.constant 7 : i32
    %155 = arith.addi %154, %c7_i32_99 : i32
    %156 = arith.index_cast %155 : i32 to index
    %157 = memref.load %arg1[%156] : memref<96xi32, #tpu.memory_space<smem>>
    %158 = arith.index_cast %157 : i32 to index
    %c0_100 = arith.constant 0 : index
    %159 = vector.load %arg7[%158, %c0_100] : memref<32x128xf32, #tpu.memory_space<vmem>>, vector<1x128xf32>
    %c15 = arith.constant 15 : index
    %c0_101 = arith.constant 0 : index
    %160 = vector.load %arg8[%c15, %c0_101] : memref<32x128xf32, #tpu.memory_space<vmem>>, vector<1x128xf32>
    tpu.vector_store %arg8[%c15, %c0_101], %159 {strides = array<i32>} : memref<32x128xf32, #tpu.memory_space<vmem>>, vector<1x128xf32>,
    %161 = arith.index_cast %157 : i32 to index
    %c0_102 = arith.constant 0 : index
    %162 = vector.load %arg6[%161, %c0_102] : memref<32x128xf32, #tpu.memory_space<vmem>>, vector<1x128xf32>
    %c15_103 = arith.constant 15 : index
    %c0_104 = arith.constant 0 : index
    %163 = vector.load %arg9[%c15_103, %c0_104] : memref<32x128xf32, #tpu.memory_space<vmem>>, vector<1x128xf32>
    tpu.vector_store %arg9[%c15_103, %c0_104], %162 {strides = array<i32>} : memref<32x128xf32, #tpu.memory_space<vmem>>, vector<1x128xf32>,
    %c16_i32 = arith.constant 16 : i32
    %164 = arith.addi %3, %c16_i32 : i32
    %c0_i32_105 = arith.constant 0 : i32
    %165 = arith.addi %164, %c0_i32_105 : i32
    %166 = arith.index_cast %165 : i32 to index
    %167 = memref.load %arg1[%166] : memref<96xi32, #tpu.memory_space<smem>>
    %168 = arith.index_cast %167 : i32 to index
    %c0_106 = arith.constant 0 : index
    %169 = vector.load %arg7[%168, %c0_106] : memref<32x128xf32, #tpu.memory_space<vmem>>, vector<1x128xf32>
    %c16 = arith.constant 16 : index
    %c0_107 = arith.constant 0 : index
    %170 = vector.load %arg8[%c16, %c0_107] : memref<32x128xf32, #tpu.memory_space<vmem>>, vector<1x128xf32>
    tpu.vector_store %arg8[%c16, %c0_107], %169 {strides = array<i32>} : memref<32x128xf32, #tpu.memory_space<vmem>>, vector<1x128xf32>,
    %171 = arith.index_cast %167 : i32 to index
    %c0_108 = arith.constant 0 : index
    %172 = vector.load %arg6[%171, %c0_108] : memref<32x128xf32, #tpu.memory_space<vmem>>, vector<1x128xf32>
    %c16_109 = arith.constant 16 : index
    %c0_110 = arith.constant 0 : index
    %173 = vector.load %arg9[%c16_109, %c0_110] : memref<32x128xf32, #tpu.memory_space<vmem>>, vector<1x128xf32>
    tpu.vector_store %arg9[%c16_109, %c0_110], %172 {strides = array<i32>} : memref<32x128xf32, #tpu.memory_space<vmem>>, vector<1x128xf32>,
    %c16_i32_111 = arith.constant 16 : i32
    %174 = arith.addi %3, %c16_i32_111 : i32
    %c1_i32_112 = arith.constant 1 : i32
    %175 = arith.addi %174, %c1_i32_112 : i32
    %176 = arith.index_cast %175 : i32 to index
    %177 = memref.load %arg1[%176] : memref<96xi32, #tpu.memory_space<smem>>
    %178 = arith.index_cast %177 : i32 to index
    %c0_113 = arith.constant 0 : index
    %179 = vector.load %arg7[%178, %c0_113] : memref<32x128xf32, #tpu.memory_space<vmem>>, vector<1x128xf32>
    %c17 = arith.constant 17 : index
    %c0_114 = arith.constant 0 : index
    %180 = vector.load %arg8[%c17, %c0_114] : memref<32x128xf32, #tpu.memory_space<vmem>>, vector<1x128xf32>
    tpu.vector_store %arg8[%c17, %c0_114], %179 {strides = array<i32>} : memref<32x128xf32, #tpu.memory_space<vmem>>, vector<1x128xf32>,
    %181 = arith.index_cast %177 : i32 to index
    %c0_115 = arith.constant 0 : index
    %182 = vector.load %arg6[%181, %c0_115] : memref<32x128xf32, #tpu.memory_space<vmem>>, vector<1x128xf32>
    %c17_116 = arith.constant 17 : index
    %c0_117 = arith.constant 0 : index
    %183 = vector.load %arg9[%c17_116, %c0_117] : memref<32x128xf32, #tpu.memory_space<vmem>>, vector<1x128xf32>
    tpu.vector_store %arg9[%c17_116, %c0_117], %182 {strides = array<i32>} : memref<32x128xf32, #tpu.memory_space<vmem>>, vector<1x128xf32>,
    %c16_i32_118 = arith.constant 16 : i32
    %184 = arith.addi %3, %c16_i32_118 : i32
    %c2_i32_119 = arith.constant 2 : i32
    %185 = arith.addi %184, %c2_i32_119 : i32
    %186 = arith.index_cast %185 : i32 to index
    %187 = memref.load %arg1[%186] : memref<96xi32, #tpu.memory_space<smem>>
    %188 = arith.index_cast %187 : i32 to index
    %c0_120 = arith.constant 0 : index
    %189 = vector.load %arg7[%188, %c0_120] : memref<32x128xf32, #tpu.memory_space<vmem>>, vector<1x128xf32>
    %c18 = arith.constant 18 : index
    %c0_121 = arith.constant 0 : index
    %190 = vector.load %arg8[%c18, %c0_121] : memref<32x128xf32, #tpu.memory_space<vmem>>, vector<1x128xf32>
    tpu.vector_store %arg8[%c18, %c0_121], %189 {strides = array<i32>} : memref<32x128xf32, #tpu.memory_space<vmem>>, vector<1x128xf32>,
    %191 = arith.index_cast %187 : i32 to index
    %c0_122 = arith.constant 0 : index
    %192 = vector.load %arg6[%191, %c0_122] : memref<32x128xf32, #tpu.memory_space<vmem>>, vector<1x128xf32>
    %c18_123 = arith.constant 18 : index
    %c0_124 = arith.constant 0 : index
    %193 = vector.load %arg9[%c18_123, %c0_124] : memref<32x128xf32, #tpu.memory_space<vmem>>, vector<1x128xf32>
    tpu.vector_store %arg9[%c18_123, %c0_124], %192 {strides = array<i32>} : memref<32x128xf32, #tpu.memory_space<vmem>>, vector<1x128xf32>,
    %c16_i32_125 = arith.constant 16 : i32
    %194 = arith.addi %3, %c16_i32_125 : i32
    %c3_i32_126 = arith.constant 3 : i32
    %195 = arith.addi %194, %c3_i32_126 : i32
    %196 = arith.index_cast %195 : i32 to index
    %197 = memref.load %arg1[%196] : memref<96xi32, #tpu.memory_space<smem>>
    %198 = arith.index_cast %197 : i32 to index
    %c0_127 = arith.constant 0 : index
    %199 = vector.load %arg7[%198, %c0_127] : memref<32x128xf32, #tpu.memory_space<vmem>>, vector<1x128xf32>
    %c19 = arith.constant 19 : index
    %c0_128 = arith.constant 0 : index
    %200 = vector.load %arg8[%c19, %c0_128] : memref<32x128xf32, #tpu.memory_space<vmem>>, vector<1x128xf32>
    tpu.vector_store %arg8[%c19, %c0_128], %199 {strides = array<i32>} : memref<32x128xf32, #tpu.memory_space<vmem>>, vector<1x128xf32>,
    %201 = arith.index_cast %197 : i32 to index
    %c0_129 = arith.constant 0 : index
    %202 = vector.load %arg6[%201, %c0_129] : memref<32x128xf32, #tpu.memory_space<vmem>>, vector<1x128xf32>
    %c19_130 = arith.constant 19 : index
    %c0_131 = arith.constant 0 : index
    %203 = vector.load %arg9[%c19_130, %c0_131] : memref<32x128xf32, #tpu.memory_space<vmem>>, vector<1x128xf32>
    tpu.vector_store %arg9[%c19_130, %c0_131], %202 {strides = array<i32>} : memref<32x128xf32, #tpu.memory_space<vmem>>, vector<1x128xf32>,
    %c16_i32_132 = arith.constant 16 : i32
    %204 = arith.addi %3, %c16_i32_132 : i32
    %c4_i32_133 = arith.constant 4 : i32
    %205 = arith.addi %204, %c4_i32_133 : i32
    %206 = arith.index_cast %205 : i32 to index
    %207 = memref.load %arg1[%206] : memref<96xi32, #tpu.memory_space<smem>>
    %208 = arith.index_cast %207 : i32 to index
    %c0_134 = arith.constant 0 : index
    %209 = vector.load %arg7[%208, %c0_134] : memref<32x128xf32, #tpu.memory_space<vmem>>, vector<1x128xf32>
    %c20 = arith.constant 20 : index
    %c0_135 = arith.constant 0 : index
    %210 = vector.load %arg8[%c20, %c0_135] : memref<32x128xf32, #tpu.memory_space<vmem>>, vector<1x128xf32>
    tpu.vector_store %arg8[%c20, %c0_135], %209 {strides = array<i32>} : memref<32x128xf32, #tpu.memory_space<vmem>>, vector<1x128xf32>,
    %211 = arith.index_cast %207 : i32 to index
    %c0_136 = arith.constant 0 : index
    %212 = vector.load %arg6[%211, %c0_136] : memref<32x128xf32, #tpu.memory_space<vmem>>, vector<1x128xf32>
    %c20_137 = arith.constant 20 : index
    %c0_138 = arith.constant 0 : index
    %213 = vector.load %arg9[%c20_137, %c0_138] : memref<32x128xf32, #tpu.memory_space<vmem>>, vector<1x128xf32>
    tpu.vector_store %arg9[%c20_137, %c0_138], %212 {strides = array<i32>} : memref<32x128xf32, #tpu.memory_space<vmem>>, vector<1x128xf32>,
    %c16_i32_139 = arith.constant 16 : i32
    %214 = arith.addi %3, %c16_i32_139 : i32
    %c5_i32_140 = arith.constant 5 : i32
    %215 = arith.addi %214, %c5_i32_140 : i32
    %216 = arith.index_cast %215 : i32 to index
    %217 = memref.load %arg1[%216] : memref<96xi32, #tpu.memory_space<smem>>
    %218 = arith.index_cast %217 : i32 to index
    %c0_141 = arith.constant 0 : index
    %219 = vector.load %arg7[%218, %c0_141] : memref<32x128xf32, #tpu.memory_space<vmem>>, vector<1x128xf32>
    %c21 = arith.constant 21 : index
    %c0_142 = arith.constant 0 : index
    %220 = vector.load %arg8[%c21, %c0_142] : memref<32x128xf32, #tpu.memory_space<vmem>>, vector<1x128xf32>
    tpu.vector_store %arg8[%c21, %c0_142], %219 {strides = array<i32>} : memref<32x128xf32, #tpu.memory_space<vmem>>, vector<1x128xf32>,
    %221 = arith.index_cast %217 : i32 to index
    %c0_143 = arith.constant 0 : index
    %222 = vector.load %arg6[%221, %c0_143] : memref<32x128xf32, #tpu.memory_space<vmem>>, vector<1x128xf32>
    %c21_144 = arith.constant 21 : index
    %c0_145 = arith.constant 0 : index
    %223 = vector.load %arg9[%c21_144, %c0_145] : memref<32x128xf32, #tpu.memory_space<vmem>>, vector<1x128xf32>
    tpu.vector_store %arg9[%c21_144, %c0_145], %222 {strides = array<i32>} : memref<32x128xf32, #tpu.memory_space<vmem>>, vector<1x128xf32>,
    %c16_i32_146 = arith.constant 16 : i32
    %224 = arith.addi %3, %c16_i32_146 : i32
    %c6_i32_147 = arith.constant 6 : i32
    %225 = arith.addi %224, %c6_i32_147 : i32
    %226 = arith.index_cast %225 : i32 to index
    %227 = memref.load %arg1[%226] : memref<96xi32, #tpu.memory_space<smem>>
    %228 = arith.index_cast %227 : i32 to index
    %c0_148 = arith.constant 0 : index
    %229 = vector.load %arg7[%228, %c0_148] : memref<32x128xf32, #tpu.memory_space<vmem>>, vector<1x128xf32>
    %c22 = arith.constant 22 : index
    %c0_149 = arith.constant 0 : index
    %230 = vector.load %arg8[%c22, %c0_149] : memref<32x128xf32, #tpu.memory_space<vmem>>, vector<1x128xf32>
    tpu.vector_store %arg8[%c22, %c0_149], %229 {strides = array<i32>} : memref<32x128xf32, #tpu.memory_space<vmem>>, vector<1x128xf32>,
    %231 = arith.index_cast %227 : i32 to index
    %c0_150 = arith.constant 0 : index
    %232 = vector.load %arg6[%231, %c0_150] : memref<32x128xf32, #tpu.memory_space<vmem>>, vector<1x128xf32>
    %c22_151 = arith.constant 22 : index
    %c0_152 = arith.constant 0 : index
    %233 = vector.load %arg9[%c22_151, %c0_152] : memref<32x128xf32, #tpu.memory_space<vmem>>, vector<1x128xf32>
    tpu.vector_store %arg9[%c22_151, %c0_152], %232 {strides = array<i32>} : memref<32x128xf32, #tpu.memory_space<vmem>>, vector<1x128xf32>,
    %c16_i32_153 = arith.constant 16 : i32
    %234 = arith.addi %3, %c16_i32_153 : i32
    %c7_i32_154 = arith.constant 7 : i32
    %235 = arith.addi %234, %c7_i32_154 : i32
    %236 = arith.index_cast %235 : i32 to index
    %237 = memref.load %arg1[%236] : memref<96xi32, #tpu.memory_space<smem>>
    %238 = arith.index_cast %237 : i32 to index
    %c0_155 = arith.constant 0 : index
    %239 = vector.load %arg7[%238, %c0_155] : memref<32x128xf32, #tpu.memory_space<vmem>>, vector<1x128xf32>
    %c23 = arith.constant 23 : index
    %c0_156 = arith.constant 0 : index
    %240 = vector.load %arg8[%c23, %c0_156] : memref<32x128xf32, #tpu.memory_space<vmem>>, vector<1x128xf32>
    tpu.vector_store %arg8[%c23, %c0_156], %239 {strides = array<i32>} : memref<32x128xf32, #tpu.memory_space<vmem>>, vector<1x128xf32>,
    %241 = arith.index_cast %237 : i32 to index
    %c0_157 = arith.constant 0 : index
    %242 = vector.load %arg6[%241, %c0_157] : memref<32x128xf32, #tpu.memory_space<vmem>>, vector<1x128xf32>
    %c23_158 = arith.constant 23 : index
    %c0_159 = arith.constant 0 : index
    %243 = vector.load %arg9[%c23_158, %c0_159] : memref<32x128xf32, #tpu.memory_space<vmem>>, vector<1x128xf32>
    tpu.vector_store %arg9[%c23_158, %c0_159], %242 {strides = array<i32>} : memref<32x128xf32, #tpu.memory_space<vmem>>, vector<1x128xf32>,
    %c24_i32 = arith.constant 24 : i32
    %244 = arith.addi %3, %c24_i32 : i32
    %c0_i32_160 = arith.constant 0 : i32
    %245 = arith.addi %244, %c0_i32_160 : i32
    %246 = arith.index_cast %245 : i32 to index
    %247 = memref.load %arg1[%246] : memref<96xi32, #tpu.memory_space<smem>>
    %248 = arith.index_cast %247 : i32 to index
    %c0_161 = arith.constant 0 : index
    %249 = vector.load %arg7[%248, %c0_161] : memref<32x128xf32, #tpu.memory_space<vmem>>, vector<1x128xf32>
    %c24 = arith.constant 24 : index
    %c0_162 = arith.constant 0 : index
    %250 = vector.load %arg8[%c24, %c0_162] : memref<32x128xf32, #tpu.memory_space<vmem>>, vector<1x128xf32>
    tpu.vector_store %arg8[%c24, %c0_162], %249 {strides = array<i32>} : memref<32x128xf32, #tpu.memory_space<vmem>>, vector<1x128xf32>,
    %251 = arith.index_cast %247 : i32 to index
    %c0_163 = arith.constant 0 : index
    %252 = vector.load %arg6[%251, %c0_163] : memref<32x128xf32, #tpu.memory_space<vmem>>, vector<1x128xf32>
    %c24_164 = arith.constant 24 : index
    %c0_165 = arith.constant 0 : index
    %253 = vector.load %arg9[%c24_164, %c0_165] : memref<32x128xf32, #tpu.memory_space<vmem>>, vector<1x128xf32>
    tpu.vector_store %arg9[%c24_164, %c0_165], %252 {strides = array<i32>} : memref<32x128xf32, #tpu.memory_space<vmem>>, vector<1x128xf32>,
    %c24_i32_166 = arith.constant 24 : i32
    %254 = arith.addi %3, %c24_i32_166 : i32
    %c1_i32_167 = arith.constant 1 : i32
    %255 = arith.addi %254, %c1_i32_167 : i32
    %256 = arith.index_cast %255 : i32 to index
    %257 = memref.load %arg1[%256] : memref<96xi32, #tpu.memory_space<smem>>
    %258 = arith.index_cast %257 : i32 to index
    %c0_168 = arith.constant 0 : index
    %259 = vector.load %arg7[%258, %c0_168] : memref<32x128xf32, #tpu.memory_space<vmem>>, vector<1x128xf32>
    %c25 = arith.constant 25 : index
    %c0_169 = arith.constant 0 : index
    %260 = vector.load %arg8[%c25, %c0_169] : memref<32x128xf32, #tpu.memory_space<vmem>>, vector<1x128xf32>
    tpu.vector_store %arg8[%c25, %c0_169], %259 {strides = array<i32>} : memref<32x128xf32, #tpu.memory_space<vmem>>, vector<1x128xf32>,
    %261 = arith.index_cast %257 : i32 to index
    %c0_170 = arith.constant 0 : index
    %262 = vector.load %arg6[%261, %c0_170] : memref<32x128xf32, #tpu.memory_space<vmem>>, vector<1x128xf32>
    %c25_171 = arith.constant 25 : index
    %c0_172 = arith.constant 0 : index
    %263 = vector.load %arg9[%c25_171, %c0_172] : memref<32x128xf32, #tpu.memory_space<vmem>>, vector<1x128xf32>
    tpu.vector_store %arg9[%c25_171, %c0_172], %262 {strides = array<i32>} : memref<32x128xf32, #tpu.memory_space<vmem>>, vector<1x128xf32>,
    %c24_i32_173 = arith.constant 24 : i32
    %264 = arith.addi %3, %c24_i32_173 : i32
    %c2_i32_174 = arith.constant 2 : i32
    %265 = arith.addi %264, %c2_i32_174 : i32
    %266 = arith.index_cast %265 : i32 to index
    %267 = memref.load %arg1[%266] : memref<96xi32, #tpu.memory_space<smem>>
    %268 = arith.index_cast %267 : i32 to index
    %c0_175 = arith.constant 0 : index
    %269 = vector.load %arg7[%268, %c0_175] : memref<32x128xf32, #tpu.memory_space<vmem>>, vector<1x128xf32>
    %c26 = arith.constant 26 : index
    %c0_176 = arith.constant 0 : index
    %270 = vector.load %arg8[%c26, %c0_176] : memref<32x128xf32, #tpu.memory_space<vmem>>, vector<1x128xf32>
    tpu.vector_store %arg8[%c26, %c0_176], %269 {strides = array<i32>} : memref<32x128xf32, #tpu.memory_space<vmem>>, vector<1x128xf32>,
    %271 = arith.index_cast %267 : i32 to index
    %c0_177 = arith.constant 0 : index
    %272 = vector.load %arg6[%271, %c0_177] : memref<32x128xf32, #tpu.memory_space<vmem>>, vector<1x128xf32>
    %c26_178 = arith.constant 26 : index
    %c0_179 = arith.constant 0 : index
    %273 = vector.load %arg9[%c26_178, %c0_179] : memref<32x128xf32, #tpu.memory_space<vmem>>, vector<1x128xf32>
    tpu.vector_store %arg9[%c26_178, %c0_179], %272 {strides = array<i32>} : memref<32x128xf32, #tpu.memory_space<vmem>>, vector<1x128xf32>,
    %c24_i32_180 = arith.constant 24 : i32
    %274 = arith.addi %3, %c24_i32_180 : i32
    %c3_i32_181 = arith.constant 3 : i32
    %275 = arith.addi %274, %c3_i32_181 : i32
    %276 = arith.index_cast %275 : i32 to index
    %277 = memref.load %arg1[%276] : memref<96xi32, #tpu.memory_space<smem>>
    %278 = arith.index_cast %277 : i32 to index
    %c0_182 = arith.constant 0 : index
    %279 = vector.load %arg7[%278, %c0_182] : memref<32x128xf32, #tpu.memory_space<vmem>>, vector<1x128xf32>
    %c27 = arith.constant 27 : index
    %c0_183 = arith.constant 0 : index
    %280 = vector.load %arg8[%c27, %c0_183] : memref<32x128xf32, #tpu.memory_space<vmem>>, vector<1x128xf32>
    tpu.vector_store %arg8[%c27, %c0_183], %279 {strides = array<i32>} : memref<32x128xf32, #tpu.memory_space<vmem>>, vector<1x128xf32>,
    %281 = arith.index_cast %277 : i32 to index
    %c0_184 = arith.constant 0 : index
    %282 = vector.load %arg6[%281, %c0_184] : memref<32x128xf32, #tpu.memory_space<vmem>>, vector<1x128xf32>
    %c27_185 = arith.constant 27 : index
    %c0_186 = arith.constant 0 : index
    %283 = vector.load %arg9[%c27_185, %c0_186] : memref<32x128xf32, #tpu.memory_space<vmem>>, vector<1x128xf32>
    tpu.vector_store %arg9[%c27_185, %c0_186], %282 {strides = array<i32>} : memref<32x128xf32, #tpu.memory_space<vmem>>, vector<1x128xf32>,
    %c24_i32_187 = arith.constant 24 : i32
    %284 = arith.addi %3, %c24_i32_187 : i32
    %c4_i32_188 = arith.constant 4 : i32
    %285 = arith.addi %284, %c4_i32_188 : i32
    %286 = arith.index_cast %285 : i32 to index
    %287 = memref.load %arg1[%286] : memref<96xi32, #tpu.memory_space<smem>>
    %288 = arith.index_cast %287 : i32 to index
    %c0_189 = arith.constant 0 : index
    %289 = vector.load %arg7[%288, %c0_189] : memref<32x128xf32, #tpu.memory_space<vmem>>, vector<1x128xf32>
    %c28 = arith.constant 28 : index
    %c0_190 = arith.constant 0 : index
    %290 = vector.load %arg8[%c28, %c0_190] : memref<32x128xf32, #tpu.memory_space<vmem>>, vector<1x128xf32>
    tpu.vector_store %arg8[%c28, %c0_190], %289 {strides = array<i32>} : memref<32x128xf32, #tpu.memory_space<vmem>>, vector<1x128xf32>,
    %291 = arith.index_cast %287 : i32 to index
    %c0_191 = arith.constant 0 : index
    %292 = vector.load %arg6[%291, %c0_191] : memref<32x128xf32, #tpu.memory_space<vmem>>, vector<1x128xf32>
    %c28_192 = arith.constant 28 : index
    %c0_193 = arith.constant 0 : index
    %293 = vector.load %arg9[%c28_192, %c0_193] : memref<32x128xf32, #tpu.memory_space<vmem>>, vector<1x128xf32>
    tpu.vector_store %arg9[%c28_192, %c0_193], %292 {strides = array<i32>} : memref<32x128xf32, #tpu.memory_space<vmem>>, vector<1x128xf32>,
    %c24_i32_194 = arith.constant 24 : i32
    %294 = arith.addi %3, %c24_i32_194 : i32
    %c5_i32_195 = arith.constant 5 : i32
    %295 = arith.addi %294, %c5_i32_195 : i32
    %296 = arith.index_cast %295 : i32 to index
    %297 = memref.load %arg1[%296] : memref<96xi32, #tpu.memory_space<smem>>
    %298 = arith.index_cast %297 : i32 to index
    %c0_196 = arith.constant 0 : index
    %299 = vector.load %arg7[%298, %c0_196] : memref<32x128xf32, #tpu.memory_space<vmem>>, vector<1x128xf32>
    %c29 = arith.constant 29 : index
    %c0_197 = arith.constant 0 : index
    %300 = vector.load %arg8[%c29, %c0_197] : memref<32x128xf32, #tpu.memory_space<vmem>>, vector<1x128xf32>
    tpu.vector_store %arg8[%c29, %c0_197], %299 {strides = array<i32>} : memref<32x128xf32, #tpu.memory_space<vmem>>, vector<1x128xf32>,
    %301 = arith.index_cast %297 : i32 to index
    %c0_198 = arith.constant 0 : index
    %302 = vector.load %arg6[%301, %c0_198] : memref<32x128xf32, #tpu.memory_space<vmem>>, vector<1x128xf32>
    %c29_199 = arith.constant 29 : index
    %c0_200 = arith.constant 0 : index
    %303 = vector.load %arg9[%c29_199, %c0_200] : memref<32x128xf32, #tpu.memory_space<vmem>>, vector<1x128xf32>
    tpu.vector_store %arg9[%c29_199, %c0_200], %302 {strides = array<i32>} : memref<32x128xf32, #tpu.memory_space<vmem>>, vector<1x128xf32>,
    %c24_i32_201 = arith.constant 24 : i32
    %304 = arith.addi %3, %c24_i32_201 : i32
    %c6_i32_202 = arith.constant 6 : i32
    %305 = arith.addi %304, %c6_i32_202 : i32
    %306 = arith.index_cast %305 : i32 to index
    %307 = memref.load %arg1[%306] : memref<96xi32, #tpu.memory_space<smem>>
    %308 = arith.index_cast %307 : i32 to index
    %c0_203 = arith.constant 0 : index
    %309 = vector.load %arg7[%308, %c0_203] : memref<32x128xf32, #tpu.memory_space<vmem>>, vector<1x128xf32>
    %c30 = arith.constant 30 : index
    %c0_204 = arith.constant 0 : index
    %310 = vector.load %arg8[%c30, %c0_204] : memref<32x128xf32, #tpu.memory_space<vmem>>, vector<1x128xf32>
    tpu.vector_store %arg8[%c30, %c0_204], %309 {strides = array<i32>} : memref<32x128xf32, #tpu.memory_space<vmem>>, vector<1x128xf32>,
    %311 = arith.index_cast %307 : i32 to index
    %c0_205 = arith.constant 0 : index
    %312 = vector.load %arg6[%311, %c0_205] : memref<32x128xf32, #tpu.memory_space<vmem>>, vector<1x128xf32>
    %c30_206 = arith.constant 30 : index
    %c0_207 = arith.constant 0 : index
    %313 = vector.load %arg9[%c30_206, %c0_207] : memref<32x128xf32, #tpu.memory_space<vmem>>, vector<1x128xf32>
    tpu.vector_store %arg9[%c30_206, %c0_207], %312 {strides = array<i32>} : memref<32x128xf32, #tpu.memory_space<vmem>>, vector<1x128xf32>,
    %c24_i32_208 = arith.constant 24 : i32
    %314 = arith.addi %3, %c24_i32_208 : i32
    %c7_i32_209 = arith.constant 7 : i32
    %315 = arith.addi %314, %c7_i32_209 : i32
    %316 = arith.index_cast %315 : i32 to index
    %317 = memref.load %arg1[%316] : memref<96xi32, #tpu.memory_space<smem>>
    %318 = arith.index_cast %317 : i32 to index
    %c0_210 = arith.constant 0 : index
    %319 = vector.load %arg7[%318, %c0_210] : memref<32x128xf32, #tpu.memory_space<vmem>>, vector<1x128xf32>
    %c31 = arith.constant 31 : index
    %c0_211 = arith.constant 0 : index
    %320 = vector.load %arg8[%c31, %c0_211] : memref<32x128xf32, #tpu.memory_space<vmem>>, vector<1x128xf32>
    tpu.vector_store %arg8[%c31, %c0_211], %319 {strides = array<i32>} : memref<32x128xf32, #tpu.memory_space<vmem>>, vector<1x128xf32>,
    %321 = arith.index_cast %317 : i32 to index
    %c0_212 = arith.constant 0 : index
    %322 = vector.load %arg6[%321, %c0_212] : memref<32x128xf32, #tpu.memory_space<vmem>>, vector<1x128xf32>
    %c31_213 = arith.constant 31 : index
    %c0_214 = arith.constant 0 : index
    %323 = vector.load %arg9[%c31_213, %c0_214] : memref<32x128xf32, #tpu.memory_space<vmem>>, vector<1x128xf32>
    tpu.vector_store %arg9[%c31_213, %c0_214], %322 {strides = array<i32>} : memref<32x128xf32, #tpu.memory_space<vmem>>, vector<1x128xf32>,
    %c0_215 = arith.constant 0 : index
    %c0_216 = arith.constant 0 : index
    %324 = vector.load %arg8[%c0_215, %c0_216] : memref<32x128xf32, #tpu.memory_space<vmem>>, vector<32x128xf32>
    %c0_217 = arith.constant 0 : index
    %c0_218 = arith.constant 0 : index
    %325 = vector.load %arg9[%c0_217, %c0_218] : memref<32x128xf32, #tpu.memory_space<vmem>>, vector<32x128xf32>
    %c0_219 = arith.constant 0 : index
    %c0_220 = arith.constant 0 : index
    %326 = vector.load %arg3[%c0_219, %c0_220] : memref<128x512xf32, #tpu.memory_space<vmem>>, vector<128x512xf32>
    %cst = arith.constant dense<0.000000e+00> : vector<32x512xf32>
    %327 = tpu.matmul %324, %326, %cst {dimension_numbers = #tpu.dot_dimension_numbers<[1], [0], [0], [1], [0, 0, 1, 1], [], []>} : vector<32x128xf32>, vector<128x512xf32>, vector<32x512xf32> -> vector<32x512xf32>
    %c0_221 = arith.constant 0 : index
    %c0_222 = arith.constant 0 : index
    %c0_223 = arith.constant 0 : index
    %328 = vector.load %arg2[%c0_221, %c0_222, %c0_223] : memref<1x8x512xf32, #tpu.memory_space<vmem>>, vector<1x8x512xf32>
    %329 = vector.shape_cast %328 : vector<1x8x512xf32> to vector<8x512xf32>
    %330 = vector.extract_strided_slice %327 {offsets = [0, 0], sizes = [8, 384], strides = [1, 1]} : vector<32x512xf32> to vector<8x384xf32>
    %331 = vector.extract_strided_slice %327 {offsets = [8, 0], sizes = [8, 384], strides = [1, 1]} : vector<32x512xf32> to vector<8x384xf32>
    %332 = arith.addf %330, %331 : vector<8x384xf32>
    %333 = vector.extract_strided_slice %327 {offsets = [16, 0], sizes = [8, 384], strides = [1, 1]} : vector<32x512xf32> to vector<8x384xf32>
    %334 = arith.addf %332, %333 : vector<8x384xf32>
    %335 = vector.extract_strided_slice %327 {offsets = [24, 0], sizes = [8, 384], strides = [1, 1]} : vector<32x512xf32> to vector<8x384xf32>
    %336 = arith.addf %334, %335 : vector<8x384xf32>
    %337 = vector.extract_strided_slice %329 {offsets = [0, 0], sizes = [8, 384], strides = [1, 1]} : vector<8x512xf32> to vector<8x384xf32>
    %338 = arith.addf %337, %336 : vector<8x384xf32>
    %c0_224 = arith.constant 0 : index
    %c0_225 = arith.constant 0 : index
    %339 = vector.load %arg4[%c0_224, %c0_225] : memref<1x384xf32, #tpu.memory_space<vmem>>, vector<1x384xf32>
    %340 = vector.broadcast %339 : vector<1x384xf32> to vector<8x384xf32>
    %341 = arith.addf %338, %340 : vector<8x384xf32>
    %342 = vector.extract_strided_slice %341 {offsets = [0, 0], sizes = [8, 128], strides = [1, 1]} : vector<8x384xf32> to vector<8x128xf32>
    %343 = arith.negf %342 : vector<8x128xf32>
    %344 = math.exp %343 : vector<8x128xf32>
    %cst_226 = arith.constant 1.000000e+00 : f32
    %345 = vector.broadcast %cst_226 : f32 to vector<8x128xf32>
    %346 = arith.addf %345, %344 : vector<8x128xf32>
    %347 = arith.divf %345, %346 : vector<8x128xf32>
    %348 = vector.extract_strided_slice %341 {offsets = [0, 128], sizes = [8, 128], strides = [1, 1]} : vector<8x384xf32> to vector<8x128xf32>
    %349 = arith.negf %348 : vector<8x128xf32>
    %350 = math.exp %349 : vector<8x128xf32>
    %cst_227 = arith.constant 1.000000e+00 : f32
    %351 = vector.broadcast %cst_227 : f32 to vector<8x128xf32>
    %352 = arith.addf %351, %350 : vector<8x128xf32>
    %353 = arith.divf %351, %352 : vector<8x128xf32>
    %354 = vector.extract_strided_slice %341 {offsets = [0, 256], sizes = [8, 128], strides = [1, 1]} : vector<8x384xf32> to vector<8x128xf32>
    %355 = math.tanh %354 : vector<8x128xf32>
    %356 = vector.extract_strided_slice %329 {offsets = [0, 384], sizes = [8, 128], strides = [1, 1]} : vector<8x512xf32> to vector<8x128xf32>
    %cst_228 = arith.constant 0.000000e+00 : f32
    %357 = vector.broadcast %cst_228 : f32 to vector<8x128xf32>
    %358 = vector.extract_strided_slice %327 {offsets = [0, 384], sizes = [8, 128], strides = [1, 1]} : vector<32x512xf32> to vector<8x128xf32>
    %c0_229 = arith.constant 0 : index
    %c0_230 = arith.constant 0 : index
    %359 = vector.load %arg5[%c0_229, %c0_230] : memref<1x128xf32, #tpu.memory_space<vmem>>, vector<1x128xf32>
    %360 = vector.broadcast %359 : vector<1x128xf32> to vector<8x128xf32>
    %361 = arith.addf %358, %360 : vector<8x128xf32>
    %362 = arith.addf %361, %356 : vector<8x128xf32>
    %363 = arith.negf %362 : vector<8x128xf32>
    %364 = math.exp %363 : vector<8x128xf32>
    %cst_231 = arith.constant 1.000000e+00 : f32
    %365 = vector.broadcast %cst_231 : f32 to vector<8x128xf32>
    %366 = arith.addf %365, %364 : vector<8x128xf32>
    %367 = arith.divf %365, %366 : vector<8x128xf32>
    %368 = vector.extract_strided_slice %325 {offsets = [0, 0], sizes = [8, 128], strides = [1, 1]} : vector<32x128xf32> to vector<8x128xf32>
    %369 = arith.mulf %367, %368 : vector<8x128xf32>
    %370 = arith.addf %357, %369 : vector<8x128xf32>
    %371 = vector.extract_strided_slice %327 {offsets = [8, 384], sizes = [8, 128], strides = [1, 1]} : vector<32x512xf32> to vector<8x128xf32>
    %c0_232 = arith.constant 0 : index
    %c0_233 = arith.constant 0 : index
    %372 = vector.load %arg5[%c0_232, %c0_233] : memref<1x128xf32, #tpu.memory_space<vmem>>, vector<1x128xf32>
    %373 = vector.broadcast %372 : vector<1x128xf32> to vector<8x128xf32>
    %374 = arith.addf %371, %373 : vector<8x128xf32>
    %375 = arith.addf %374, %356 : vector<8x128xf32>
    %376 = arith.negf %375 : vector<8x128xf32>
    %377 = math.exp %376 : vector<8x128xf32>
    %cst_234 = arith.constant 1.000000e+00 : f32
    %378 = vector.broadcast %cst_234 : f32 to vector<8x128xf32>
    %379 = arith.addf %378, %377 : vector<8x128xf32>
    %380 = arith.divf %378, %379 : vector<8x128xf32>
    %381 = vector.extract_strided_slice %325 {offsets = [8, 0], sizes = [8, 128], strides = [1, 1]} : vector<32x128xf32> to vector<8x128xf32>
    %382 = arith.mulf %380, %381 : vector<8x128xf32>
    %383 = arith.addf %370, %382 : vector<8x128xf32>
    %384 = vector.extract_strided_slice %327 {offsets = [16, 384], sizes = [8, 128], strides = [1, 1]} : vector<32x512xf32> to vector<8x128xf32>
    %c0_235 = arith.constant 0 : index
    %c0_236 = arith.constant 0 : index
    %385 = vector.load %arg5[%c0_235, %c0_236] : memref<1x128xf32, #tpu.memory_space<vmem>>, vector<1x128xf32>
    %386 = vector.broadcast %385 : vector<1x128xf32> to vector<8x128xf32>
    %387 = arith.addf %384, %386 : vector<8x128xf32>
    %388 = arith.addf %387, %356 : vector<8x128xf32>
    %389 = arith.negf %388 : vector<8x128xf32>
    %390 = math.exp %389 : vector<8x128xf32>
    %cst_237 = arith.constant 1.000000e+00 : f32
    %391 = vector.broadcast %cst_237 : f32 to vector<8x128xf32>
    %392 = arith.addf %391, %390 : vector<8x128xf32>
    %393 = arith.divf %391, %392 : vector<8x128xf32>
    %394 = vector.extract_strided_slice %325 {offsets = [16, 0], sizes = [8, 128], strides = [1, 1]} : vector<32x128xf32> to vector<8x128xf32>
    %395 = arith.mulf %393, %394 : vector<8x128xf32>
    %396 = arith.addf %383, %395 : vector<8x128xf32>
    %397 = vector.extract_strided_slice %327 {offsets = [24, 384], sizes = [8, 128], strides = [1, 1]} : vector<32x512xf32> to vector<8x128xf32>
    %c0_238 = arith.constant 0 : index
    %c0_239 = arith.constant 0 : index
    %398 = vector.load %arg5[%c0_238, %c0_239] : memref<1x128xf32, #tpu.memory_space<vmem>>, vector<1x128xf32>
    %399 = vector.broadcast %398 : vector<1x128xf32> to vector<8x128xf32>
    %400 = arith.addf %397, %399 : vector<8x128xf32>
    %401 = arith.addf %400, %356 : vector<8x128xf32>
    %402 = arith.negf %401 : vector<8x128xf32>
    %403 = math.exp %402 : vector<8x128xf32>
    %cst_240 = arith.constant 1.000000e+00 : f32
    %404 = vector.broadcast %cst_240 : f32 to vector<8x128xf32>
    %405 = arith.addf %404, %403 : vector<8x128xf32>
    %406 = arith.divf %404, %405 : vector<8x128xf32>
    %407 = vector.extract_strided_slice %325 {offsets = [24, 0], sizes = [8, 128], strides = [1, 1]} : vector<32x128xf32> to vector<8x128xf32>
    %408 = arith.mulf %406, %407 : vector<8x128xf32>
    %409 = arith.addf %396, %408 : vector<8x128xf32>
    %410 = arith.mulf %347, %355 : vector<8x128xf32>
    %411 = arith.addf %410, %409 : vector<8x128xf32>
    %412 = math.tanh %411 : vector<8x128xf32>
    %413 = arith.mulf %353, %412 : vector<8x128xf32>
    %c8_i32_241 = arith.constant 8 : i32
    %414 = arith.muli %arg0, %c8_i32_241 : i32
    %415 = tpu.assume_multiple %414, 8 : i32
    %416 = arith.index_cast %415 : i32 to index
    %c0_242 = arith.constant 0 : index
    %417 = vector.load %arg6[%416, %c0_242] : memref<32x128xf32, #tpu.memory_space<vmem>>, vector<8x128xf32>
    tpu.vector_store %arg6[%416, %c0_242], %411 {strides = array<i32>} : memref<32x128xf32, #tpu.memory_space<vmem>>, vector<8x128xf32>,
    %418 = arith.index_cast %415 : i32 to index
    %c0_243 = arith.constant 0 : index
    %419 = vector.load %arg7[%418, %c0_243] : memref<32x128xf32, #tpu.memory_space<vmem>>, vector<8x128xf32>
    tpu.vector_store %arg7[%418, %c0_243], %413 {strides = array<i32>} : memref<32x128xf32, #tpu.memory_space<vmem>>, vector<8x128xf32>,
    return
  }
  func.func @transform_0(%arg0: i32, %arg1: memref<96xi32, #tpu.memory_space<smem>>) -> (i32, i32, i32) {
    %c0_i32 = arith.constant 0 : i32
    %c0_i32_0 = arith.constant 0 : i32
    %c0_i32_1 = arith.constant 0 : i32
    return %arg0, %c0_i32, %c0_i32_0 : i32, i32, i32
  }
  func.func @transform_1(%arg0: i32, %arg1: memref<96xi32, #tpu.memory_space<smem>>) -> (i32, i32) {
    %c0_i32 = arith.constant 0 : i32
    %c0_i32_0 = arith.constant 0 : i32
    %c0_i32_1 = arith.constant 0 : i32
    return %c0_i32, %c0_i32_0 : i32, i32
  }
  func.func @transform_2(%arg0: i32, %arg1: memref<96xi32, #tpu.memory_space<smem>>) -> (i32, i32) {
    %c0_i32 = arith.constant 0 : i32
    %c0_i32_0 = arith.constant 0 : i32
    %c0_i32_1 = arith.constant 0 : i32
    return %c0_i32, %c0_i32_0 : i32, i32
  }
  func.func @transform_3(%arg0: i32, %arg1: memref<96xi32, #tpu.memory_space<smem>>) -> (i32, i32) {
    %c0_i32 = arith.constant 0 : i32
    %c0_i32_0 = arith.constant 0 : i32
    %c0_i32_1 = arith.constant 0 : i32
    return %c0_i32, %c0_i32_0 : i32, i32
  }
  func.func @transform_4(%arg0: i32, %arg1: memref<96xi32, #tpu.memory_space<smem>>) -> (i32, i32) {
    %c0_i32 = arith.constant 0 : i32
    %c0_i32_0 = arith.constant 0 : i32
    %c0_i32_1 = arith.constant 0 : i32
    return %c0_i32, %c0_i32_0 : i32, i32
  }
  func.func @transform_5(%arg0: i32, %arg1: memref<96xi32, #tpu.memory_space<smem>>) -> (i32, i32) {
    %c0_i32 = arith.constant 0 : i32
    %c0_i32_0 = arith.constant 0 : i32
    %c0_i32_1 = arith.constant 0 : i32
    return %c0_i32, %c0_i32_0 : i32, i32
  }
}

</mosaic_0001>

<bundles_post_ra>
// kernel: tpu_custom_call.1
= control target key start
LH: loop header
LB: loop body
LE: loop exit
PB: predicated region body
PF: predicated region fallthrough
CT: control target
= control target key end

     0   :  { %s1318_s21 = smov [#allocation5]   ;;  %s1661_s0 = inlined_call_operand.hbm [shape: s32[96], index: 0, kind: input, shape index: {}]   ;;  %s1662_s1 = inlined_call_operand.hbm [shape: f32[3,8,512], index: 1, kind: input, shape index: {}]   ;;  %s1663_s2 = inlined_call_operand.hbm [shape: f32[128,512], index: 2, kind: input, shape index: {}]   ;;  %s1664_s3 = inlined_call_operand.vmem [shape: f32[1,384], index: 3, kind: input, shape index: {}]   ;;  %s1665_s4 = inlined_call_operand.vmem [shape: f32[1,128], index: 4, kind: input, shape index: {}]   ;;  %s1666_s5 = inlined_call_operand.hbm [shape: f32[32,128], index: 5, kind: output, shape index: {0}]   ;;  %s1667_s6 = inlined_call_operand.hbm [shape: f32[32,128], index: 6, kind: output, shape index: {1}]  }
   0x1   :  { %13 = dma.hbm_to_smem %s1661_s0, 16, %s1318_s21, [#allocation4] }
   0x2   :  { %1284 = dma.done.wait [#allocation4], 16 }
   0x3   :  { %1285 = vsyncadd [#allocation4], 4294967280 }
   0x4   :  { %15 = sfence }
   0x5   :  { %16 = vsyncpa [#allocation7], 0 }
   0x6   :  { %18 = vsyncpa [#allocation7 + $0x1], 0 }
   0x7   :  { %19 = vsyncpa [#allocation10], 0 }
   0x8   :  { %20 = vsyncpa [#allocation8], 0 }
   0x9   :  { %21 = vsyncpa [#allocation13], 0  ;;  %s1367_s24 = smov 0   ;;  %s1369_s25 = smov 0  }
   0xa   :  { %s1371_s26 = smov 0   ;;  %s1373_s27 = smov 0  }
   0xb LB: > { %s1386_s0 = sadd.s32 4294967295, %s1316_s27   ;;  %p47_p0 = scmp.ne.s32.totalorder %s1308_s25, %s1304_s24  ;;  %s1316_s27 = sphi %s1373_s27, %s1683_s27   ;;  %s1312_s26 = sphi %s1371_s26, %s1682_s26   ;;  %s1308_s25 = sphi %s1369_s25, %s1681_s25   ;;  %s1304_s24 = sphi %s1367_s24, %s1680_s24  }
   0xc   : > { %p1668_p1 = scmp.eq.s32.totalorder %s1386_s0, 0  ;;  %p1033_p2 = scmp.ge.s32.totalorder %s1316_s27, 1 }
   0xd   : > { %p163_p3 = scmp.lt.s32.totalorder %s1316_s27, 4  ;;  %s1319_s30 = smov [#allocation9]  }
   0xe   : > { %p1395_p5 = por %p1668_p1, %p47_p0  ;;  %s175_s7 = sshll.u32 %s1319_s30, 4  ;;  %s176_s7 = int_to_ptr.vmem [resolvable:$true] %s175_s7 }
   0xf   : > { %p1399_p6 = pnand %p1033_p2, %p163_p3  ;;  %s1412_s9 = sadd.s32 1, %s1316_s27  }
  0x10   : > { %s1671_s28 = scalar_select %p1395_p5, 1, 0 }
  0x11   : > { %s1672_s29 = scalar_select %p1399_p6, 1, 0 }
  0x12   : > { %p1073_p7 = pneg %p1399_p6  ;;  %s34_s10 = sadd.s32 1, %s1312_s26 }
  0x13   : > { %s31_s11 = ssub.s32 %s1316_s27, %s1412_s9  ;;  %s1177_s12 = scalar_lea.vmem %s176_s7, 8192 }
  0x14   : > { %p1407_p8 = pnand %p1073_p7, %p1668_p1  ;;  %p1178_p10 = scmp.ne.s32.totalorder %s176_s7, %s1177_s12 }
  0x15   : > { %p1185_p13 = scmp.lt.s32.totalorder %s176_s7, %s176_s7  ;;  %p1186_p0 = scmp.lt.s32.totalorder %s1177_s12, %s1177_s12 }
  0x16   : > { %p1168_p9 = pneg %p1407_p8 }
  0x17   : > { %p1187_p2 = por %p1186_p0, %p1185_p13 }
  0x18   : > { %p1180_p11 = pnand %p1178_p10, %p1168_p9 }
  0x1a   : > { %p1181_p12 = pneg %p1180_p11 }
  0x1c   : > { %p1188_p3 = pnand %p1187_p2, %p1181_p12 }
  0x1e   : > { %1191 = shalt.err (!%p1188_p3)
}
  0x1f   : > { %s1320_s13 = smov 512   ;;  %s1321_s14 = smov 32  }
  0x20   : > { %1076 = dma.hbm_to_vmem [thread:$0]  (!%p1407_p8), %s1663_s2, 8192, %s176_s7, [#allocation10], %s1320_s13, %s1320_s13, %s1321_s14  }
  0x21   : > { %p32_p7 = scmp.eq.s32.totalorder %s31_s11, 0  ;;  %p41_p9 = scmp.ne.s32.totalorder %s1312_s26, %s1308_s25 }
  0x22   : > { %p42_p10 = scmp.eq.s32.totalorder %s1316_s27, 0  ;;  %p1082_p11 = scmp.lt.s32.totalorder %s1316_s27, 3 }
  0x23   : > { %s1429_s17 = scalar_select %p32_p7, %s1312_s26, %s34_s10  }
  0x24   : > { %p43_p12 = por %p42_p10, %p41_p9  ;;  %s195_s18 = sand.u32 1, %s1312_s26  }
  0x25   : > { %s1036_s19 = sshll.u32 %s195_s18, 5  ;;  %s1058_s20 = sshll.u32 %s1316_s27, 9 }
  0x26   : > { %s1436_s23 = scalar_lea.hbm %s1662_s1, %s1058_s20  ;;  %s199_s24 = scalar_lea.vmem [#allocation6], %s1036_s19 }
  0x27   : > { %s207_s30 = sshll.u32 %s199_s24, 4  ;;  %p1438_p8 = pnand %p1082_p11, %p43_p12  ;;  %s208_s30 = int_to_ptr.vmem [resolvable:$true] %s207_s30 }
  0x28   : > { %s196_s8 = scalar_lea.sflag [#allocation7], %s195_s18  ;;  %s1192_s10 = scalar_lea.hbm %s1436_s23, 512 }
  0x29   : > { %p1193_p13 = scmp.ne.s32.totalorder %s1436_s23, %s1192_s10  ;;  %p1194_p0 = pneg %p1438_p8 }
  0x2a   : > { %s1197_s12 = scalar_lea.hbm %s1662_s1, 1536  ;;  %p1198_p7 = scmp.lt.s32.totalorder %s1436_s23, %s1662_s1 }
  0x2b   : > { %p1195_p2 = pnand %p1194_p0, %p1193_p13  ;;  %p1199_p9 = scmp.lt.s32.totalorder %s1197_s12, %s1192_s10 }
  0x2d   : > { %p1196_p3 = pneg %p1195_p2  ;;  %p1200_p10 = por %p1199_p9, %p1198_p7 }
  0x2f   : > { %p1201_p11 = pnand %p1200_p10, %p1196_p3 }
  0x31   : > { %1204 = shalt.err (!%p1201_p11)
}
  0x32   : > { %s1205_s15 = scalar_lea.vmem %s208_s30, 512  ;;  %s1322_s16 = smov [#allocation6]  }
  0x33   : > { %p1206_p12 = scmp.ne.s32.totalorder %s208_s30, %s1205_s15  ;;  %s1210_s18 = sshll.u32 %s1322_s16, 4  ;;  %s1211_s18 = int_to_ptr.vmem [resolvable:$false] %s1210_s18 }
  0x34   : > { %s1212_s19 = scalar_lea.vmem %s1211_s18, 1024  ;;  %p1213_p13 = scmp.lt.s32.totalorder %s208_s30, %s1211_s18 }
  0x35   : > { %p1208_p4 = pnand %p1206_p12, %p1194_p0  ;;  %p1214_p2 = scmp.lt.s32.totalorder %s1212_s19, %s1205_s15 }
  0x37   : > { %p1209_p1 = pneg %p1208_p4  ;;  %p1215_p5 = por %p1214_p2, %p1213_p13 }
  0x39   : > { %p1216_p6 = pnand %p1215_p5, %p1209_p1 }
  0x3b   : > { %1219 = shalt.err (!%p1216_p6)
}
  0x3c   : > { %1080 = dma.hbm_to_vmem [thread:$0]  (!%p1438_p8), %s1436_s23, 512, %s208_s30, %s196_s8  }
  0x3d   : > { %p1675_p3 = scmp.ne.s32.totalorder %s1672_s29, 0 }
  0x3e   : > { %s218_s20 = sand.u32 (!%p1675_p3), 1, %s1308_s25   ;;  %p1676_p4 = scmp.ne.s32.totalorder (!%p1675_p3), %s1671_s28, 0 }
  0x3f   : > { %216 = sbr.rel (%p1675_p3) target bundleno = 436 (0x1b4), region = 36  ;;  %s1040_s21 = sshll.u32 (!%p1675_p3), %s218_s20, 5 }
  0x40   : > { %s219_s22 = scalar_lea.sflag (!%p1675_p3), [#allocation7], %s218_s20  ;;  %s1459_s24 = scalar_lea.vmem (!%p1675_p3), [#allocation6], %s1040_s21 }
  0x44   : > { %1287 = dma.done.wait (%p1676_p4), %s219_s22, 512  }
  0x45   : > { %1289 = vsyncadd (%p1676_p4), %s219_s22, 4294966784  ;;  %p1677_p1 = scmp.eq.s32.totalorder %s1386_s0, 0 }
  0x47   : > { %1291 = dma.done.wait (%p1677_p1), [#allocation10], 8192   ;;  %p1678_p5 = pmov %p1677_p1 }
  0x48   : > { %p1679_p6 = scmp.ne.s32.totalorder %s1386_s0, 0 }
  0x49   : > { %1293 = vsyncadd (%p1678_p5), [#allocation10], 4294959104 }
  0x4a   : > { %251 = sbr.rel (%p1679_p6) target bundleno = 84 (0x54), region = 48 }
  0x4f   : > { %v1323_v0 = vmov 0.0  }
  0x50   : > { %252 = vst [vmem:[#allocation11] sm:$0xff] %v1323_v0  ;;  %253 = vst [vmem:[#allocation11 + $0x8] sm:$0xff] %v1323_v0 }
  0x51   : > { %254 = vst [vmem:[#allocation11 + $0x10] sm:$0xff] %v1323_v0  ;;  %255 = vst [vmem:[#allocation11 + $0x18] sm:$0xff] %v1323_v0 }
  0x52   : > { %256 = vst [vmem:[#allocation12] sm:$0xff] %v1323_v0  ;;  %257 = vst [vmem:[#allocation12 + $0x8] sm:$0xff] %v1323_v0 }
  0x53   : > { %258 = vst [vmem:[#allocation12 + $0x10] sm:$0xff] %v1323_v0  ;;  %259 = vst [vmem:[#allocation12 + $0x18] sm:$0xff] %v1323_v0 }
  0x54 PF: > { %v585_v1 = vld [vmem:[#allocation9 + $0x1e8] sm:$0xff]  ;;  %v587_v2 = vld [vmem:[#allocation9 + $0x1f8] sm:$0xff]  ;;  %v584_v3 = vld [vmem:[#allocation9 + $0x1e0] sm:$0xff]  ;;  %s1472_s28 = sshll.u32 %s1386_s0, 5  ;;  %p1084_p8 = scmp.eq.s32.totalorder %s1386_s0, 2 }
  0x55   : > { %588 = vmatprep.subr.mxu0 %v585_v1  ;;  %677 = vmatprep.subr.mxu1 %v587_v2  ;;  %v586_v4 = vld [vmem:[#allocation9 + $0x1f0] sm:$0xff]  ;;  %v581_v5 = vld [vmem:[#allocation9 + $0x1c8] sm:$0xff]  ;;  %v583_v6 = vld [vmem:[#allocation9 + $0x1d8] sm:$0xff]  ;;  %s1475_s29 = sld [smem:[#allocation5 + %s1472_s28]]  ;;  %s268_s23 = sadd.s32 1, %s1472_s28 }
  0x56   : > { %589 = vmatpush1.msra.mxu0 %v584_v3  ;;  %678 = vmatpush1.msra.mxu1 %v586_v4  ;;  %v580_v7 = vld [vmem:[#allocation9 + $0x1c0] sm:$0xff]  ;;  %v582_v8 = vld [vmem:[#allocation9 + $0x1d0] sm:$0xff]  ;;  %v577_v9 = vld [vmem:[#allocation9 + $0x1a8] sm:$0xff]  ;;  %s1478_s30 = sld [smem:[#allocation5 + %s268_s23]]  ;;  %s276_s7 = sadd.s32 2, %s1472_s28 }
  0x57   : > { %590 = vmatprep.subr.mxu0 %v581_v5  ;;  %679 = vmatprep.subr.mxu1 %v583_v6  ;;  %v579_v10 = vld [vmem:[#allocation9 + $0x1b8] sm:$0xff]  ;;  %v576_v11 = vld [vmem:[#allocation9 + $0x1a0] sm:$0xff]  ;;  %v578_v12 = vld [vmem:[#allocation9 + $0x1b0] sm:$0xff]  ;;  %s1481_s8 = sld [smem:[#allocation5 + %s276_s7]]  ;;  %s284_s10 = sadd.s32 3, %s1472_s28 }
  0x58   : > { %591 = vmatpush1.msra.mxu0 %v580_v7  ;;  %680 = vmatpush1.msra.mxu1 %v582_v8  ;;  %v573_v13 = vld [vmem:[#allocation9 + $0x188] sm:$0xff]  ;;  %v575_v14 = vld [vmem:[#allocation9 + $0x198] sm:$0xff]  ;;  %s1484_s27 = sld [smem:[#allocation5 + %s284_s10]]  ;;  %s292_s11 = sadd.s32 4, %s1472_s28  ;;  %v572_v15 = vld [vmem:[#allocation9 + $0x180] sm:$0xff] }
  0x59   : > { %592 = vmatprep.subr.mxu0 %v577_v9  ;;  %681 = vmatprep.subr.mxu1 %v579_v10  ;;  %v574_v16 = vld [vmem:[#allocation9 + $0x190] sm:$0xff]  ;;  %s1487_s12 = sld [smem:[#allocation5 + %s292_s11]]  ;;  %s300_s13 = sadd.s32 5, %s1472_s28  ;;  %v569_v17 = vld [vmem:[#allocation9 + $0x168] sm:$0xff]  ;;  %v571_v18 = vld [vmem:[#allocation9 + $0x178] sm:$0xff] }
  0x5a   : > { %593 = vmatpush1.msra.mxu0 %v576_v11  ;;  %682 = vmatpush1.msra.mxu1 %v578_v12  ;;  %s1490_s14 = sld [smem:[#allocation5 + %s300_s13]]  ;;  %v568_v19 = vld [vmem:[#allocation9 + $0x160] sm:$0xff]  ;;  %v570_v20 = vld [vmem:[#allocation9 + $0x170] sm:$0xff]  ;;  %s308_s15 = sadd.s32 6, %s1472_s28  ;;  %v565_v21 = vld [vmem:[#allocation9 + $0x148] sm:$0xff] }
  0x5b   : > { %594 = vmatprep.subr.mxu0 %v573_v13  ;;  %683 = vmatprep.subr.mxu1 %v575_v14  ;;  %v567_v22 = vld [vmem:[#allocation9 + $0x158] sm:$0xff]  ;;  %v564_v23 = vld [vmem:[#allocation9 + $0x140] sm:$0xff]  ;;  %v566_v24 = vld [vmem:[#allocation9 + $0x150] sm:$0xff]  ;;  %s1493_s16 = sld [smem:[#allocation5 + %s308_s15]]  ;;  %s316_s18 = sadd.s32 7, %s1472_s28 }
  0x5c   : > { %595 = vmatpush1.msra.mxu0 %v572_v15  ;;  %684 = vmatpush1.msra.mxu1 %v574_v16  ;;  %v561_v25 = vld [vmem:[#allocation9 + $0x128] sm:$0xff]  ;;  %v563_v26 = vld [vmem:[#allocation9 + $0x138] sm:$0xff]  ;;  %v560_v27 = vld [vmem:[#allocation9 + $0x120] sm:$0xff]  ;;  %s1496_s19 = sld [smem:[#allocation5 + %s316_s18]]  ;;  %s324_s20 = sadd.s32 8, %s1472_s28 }
  0x5d   : > { %596 = vmatprep.subr.mxu0 %v569_v17  ;;  %685 = vmatprep.subr.mxu1 %v571_v18  ;;  %v562_v28 = vld [vmem:[#allocation9 + $0x130] sm:$0xff]  ;;  %v557_v29 = vld [vmem:[#allocation9 + $0x108] sm:$0xff]  ;;  %v559_v30 = vld [vmem:[#allocation9 + $0x118] sm:$0xff]  ;;  %s1499_s21 = sld [smem:[#allocation5 + %s324_s20]]  ;;  %s332_s22 = sadd.s32 9, %s1472_s28 }
  0x5e   : > { %597 = vmatpush1.msra.mxu0 %v568_v19  ;;  %686 = vmatpush1.msra.mxu1 %v570_v20  ;;  %v556_v31 = vld [vmem:[#allocation9 + $0x100] sm:$0xff]  ;;  %v558_v32 = vld [vmem:[#allocation9 + $0x110] sm:$0xff]  ;;  %v553_v33 = vld [vmem:[#allocation9 + $0xe8] sm:$0xff]  ;;  %s1502_s23 = sld [smem:[#allocation5 + %s332_s22]]  ;;  %s340_s7 = sadd.s32 10, %s1472_s28 }
  0x5f   : > { %598 = vmatprep.subr.mxu0 %v565_v21  ;;  %687 = vmatprep.subr.mxu1 %v567_v22  ;;  %v555_v34 = vld [vmem:[#allocation9 + $0xf8] sm:$0xff]  ;;  %v552_v35 = vld [vmem:[#allocation9 + $0xe0] sm:$0xff]  ;;  %v554_v36 = vld [vmem:[#allocation9 + $0xf0] sm:$0xff]  ;;  %s1505_s10 = sld [smem:[#allocation5 + %s340_s7]]  ;;  %s348_s11 = sadd.s32 11, %s1472_s28 }
  0x60   : > { %599 = vmatpush1.msra.mxu0 %v564_v23  ;;  %688 = vmatpush1.msra.mxu1 %v566_v24  ;;  %v549_v37 = vld [vmem:[#allocation9 + $0xc8] sm:$0xff]  ;;  %v551_v38 = vld [vmem:[#allocation9 + $0xd8] sm:$0xff]  ;;  %v548_v39 = vld [vmem:[#allocation9 + $0xc0] sm:$0xff]  ;;  %s1508_s13 = sld [smem:[#allocation5 + %s348_s11]]  ;;  %s356_s15 = sadd.s32 12, %s1472_s28 }
  0x61   : > { %600 = vmatprep.subr.mxu0 %v561_v25  ;;  %689 = vmatprep.subr.mxu1 %v563_v26  ;;  %v550_v40 = vld [vmem:[#allocation9 + $0xd0] sm:$0xff]  ;;  %v545_v41 = vld [vmem:[#allocation9 + $0xa8] sm:$0xff]  ;;  %v547_v42 = vld [vmem:[#allocation9 + $0xb8] sm:$0xff]  ;;  %s262_s18 = scalar_lea.vmem [#allocation12], %s1475_s29  ;;  %s265_s20 = scalar_lea.vmem [#allocation11], %s1475_s29  ;;  %v1324_v25 = vmov 0.0  }
  0x62   : > { %601 = vmatpush1.msra.mxu0 %v560_v27  ;;  %690 = vmatpush1.msra.mxu1 %v562_v28  ;;  %v544_v43 = vld [vmem:[#allocation9 + $0xa0] sm:$0xff]  ;;  %v546_v44 = vld [vmem:[#allocation9 + $0xb0] sm:$0xff]  ;;  %v541_v45 = vld [vmem:[#allocation9 + $0x88] sm:$0xff]  ;;  %s270_s22 = scalar_lea.vmem [#allocation12], %s1478_s30  ;;  %s273_s7 = scalar_lea.vmem [#allocation11], %s1478_s30 }
  0x63   : > { %602 = vmatprep.subr.mxu0 %v557_v29  ;;  %691 = vmatprep.subr.mxu1 %v559_v30  ;;  %v543_v46 = vld [vmem:[#allocation9 + $0x98] sm:$0xff]  ;;  %v540_v47 = vld [vmem:[#allocation9 + $0x80] sm:$0xff]  ;;  %v542_v48 = vld [vmem:[#allocation9 + $0x90] sm:$0xff]  ;;  %s278_s11 = scalar_lea.vmem [#allocation12], %s1481_s8  ;;  %s281_s29 = scalar_lea.vmem [#allocation11], %s1481_s8 }
  0x64   : > { %603 = vmatpush1.msra.mxu0 %v556_v31  ;;  %692 = vmatpush1.msra.mxu1 %v558_v32  ;;  %v537_v49 = vld [vmem:[#allocation9 + $0x68] sm:$0xff]  ;;  %v539_v50 = vld [vmem:[#allocation9 + $0x78] sm:$0xff]  ;;  %v536_v51 = vld [vmem:[#allocation9 + $0x60] sm:$0xff]  ;;  %s294_s30 = scalar_lea.vmem [#allocation12], %s1487_s12  ;;  %s302_s8 = scalar_lea.vmem [#allocation12], %s1490_s14 }
  0x65   : > { %604 = vmatprep.subr.mxu0 %v553_v33  ;;  %693 = vmatprep.subr.mxu1 %v555_v34  ;;  %v538_v52 = vld [vmem:[#allocation9 + $0x70] sm:$0xff]  ;;  %v263_v53 = vld [vmem:[%s262_s18] sm:$0x1]  ;;  %v533_v55 = vld [vmem:[#allocation9 + $0x48] sm:$0xff]  ;;  %s286_s18 = scalar_lea.vmem [#allocation12], %s1484_s27 }
  0x66   : > { %605 = vmatpush1.msra.mxu0 %v552_v35  ;;  %694 = vmatpush1.msra.mxu1 %v554_v36  ;;  %v266_v54 = vld [vmem:[%s265_s20] sm:$0x1]  ;;  %264 = vst [vmem:[#allocation2] sm:$0x1] %v263_v53  ;;  %v532_v60 = vld [vmem:[#allocation9 + $0x40] sm:$0xff]  ;;  %v534_v61 = vld [vmem:[#allocation9 + $0x50] sm:$0xff] }
  0x67   : > { %606 = vmatprep.subr.mxu0 %v549_v37  ;;  %695 = vmatprep.subr.mxu1 %v551_v38  ;;  %v535_v56 = vld [vmem:[#allocation9 + $0x58] sm:$0xff]  ;;  %267 = vst [vmem:[#allocation3] sm:$0x1] %v266_v54  ;;  %s289_s20 = scalar_lea.vmem [#allocation11], %s1484_s27  ;;  %v529_v1 = vld [vmem:[#allocation9 + $0x28] sm:$0xff]  ;;  %v528_v6 = vld [vmem:[#allocation9 + $0x20] sm:$0xff] }
  0x68   : > { %607 = vmatpush1.msra.mxu0 %v548_v39  ;;  %696 = vmatpush1.msra.mxu1 %v550_v40  ;;  %v271_v57 = vld [vmem:[%s270_s22] sm:$0x1]  ;;  %s297_s22 = scalar_lea.vmem [#allocation11], %s1487_s12  ;;  %v530_v7 = vld [vmem:[#allocation9 + $0x30] sm:$0xff]  ;;  %s305_s27 = scalar_lea.vmem [#allocation11], %s1490_s14  ;;  %v525_v14 = vld [vmem:[#allocation9 + $0x8] sm:$0xff] }
  0x69   : > { %608 = vmatprep.subr.mxu0 %v545_v41  ;;  %697 = vmatprep.subr.mxu1 %v547_v42  ;;  %v274_v58 = vld [vmem:[%s273_s7] sm:$0x1]  ;;  %272 = vst [vmem:[#allocation2 + $0x1] sm:$0x1] %v271_v57  ;;  %s310_s7 = scalar_lea.vmem [#allocation12], %s1493_s16  ;;  %s318_s12 = scalar_lea.vmem [#allocation12], %s1496_s19 }
  0x6a   : > { %609 = vmatpush1.msra.mxu0 %v544_v43  ;;  %698 = vmatpush1.msra.mxu1 %v546_v44  ;;  %v279_v59 = vld [vmem:[%s278_s11] sm:$0x1]  ;;  %275 = vst [vmem:[#allocation3 + $0x1] sm:$0x1] %v274_v58  ;;  %s313_s11 = scalar_lea.vmem [#allocation11], %s1493_s16  ;;  %v524_v16 = vld [vmem:[#allocation9] sm:$0xff] }
  0x6b   : > { %610 = vmatprep.subr.mxu0 %v541_v45  ;;  %699 = vmatprep.subr.mxu1 %v543_v46  ;;  %280 = vst [vmem:[#allocation2 + $0x2] sm:$0x1] %v279_v59  ;;  %v282_v62 = vld [vmem:[%s281_s29] sm:$0x1]  ;;  %s321_s29 = scalar_lea.vmem [#allocation11], %s1496_s19  ;;  %v526_v17 = vld [vmem:[#allocation9 + $0x10] sm:$0xff] }
  0x6c   : > { %v287_v63 = vld [vmem:[%s286_s18] sm:$0x1]  ;;  %611 = vmatpush1.msra.mxu0 %v540_v47  ;;  %700 = vmatpush1.msra.mxu1 %v542_v48  ;;  %283 = vst [vmem:[#allocation3 + $0x2] sm:$0x1] %v282_v62  ;;  %s326_s18 = scalar_lea.vmem [#allocation12], %s1499_s21  ;;  %s329_s14 = scalar_lea.vmem [#allocation11], %s1499_s21 }
  0x6d   : > { %v290_v0 = vld [vmem:[%s289_s20] sm:$0x1]  ;;  %288 = vst [vmem:[#allocation2 + $0x3] sm:$0x1] %v287_v63  ;;  %612 = vmatprep.subr.mxu0 %v537_v49  ;;  %701 = vmatprep.subr.mxu1 %v539_v50  ;;  %s334_s16 = scalar_lea.vmem [#allocation12], %s1502_s23  ;;  %s337_s19 = scalar_lea.vmem [#allocation11], %s1502_s23 }
  0x6e   : > { %v531_v2 = vld [vmem:[#allocation9 + $0x38] sm:$0xff]  ;;  %291 = vst [vmem:[#allocation3 + $0x3] sm:$0x1] %v290_v0  ;;  %613 = vmatpush1.msra.mxu0 %v536_v51  ;;  %702 = vmatpush1.msra.mxu1 %v538_v52  ;;  %s342_s20 = scalar_lea.vmem [#allocation12], %s1505_s10  ;;  %s345_s21 = scalar_lea.vmem [#allocation11], %s1505_s10 }
  0x6f   : > { %v295_v3 = vld [vmem:[%s294_s30] sm:$0x1]  ;;  %614 = vmatprep.subr.mxu0 %v533_v55  ;;  %703 = vmatprep.subr.mxu1 %v535_v56  ;;  %s350_s30 = scalar_lea.vmem [#allocation12], %s1508_s13  ;;  %s353_s23 = scalar_lea.vmem [#allocation11], %s1508_s13 }
  0x70   : > { %v298_v4 = vld [vmem:[%s297_s22] sm:$0x1]  ;;  %296 = vst [vmem:[#allocation2 + $0x4] sm:$0x1] %v295_v3  ;;  %615 = vmatpush1.msra.mxu0 %v532_v60  ;;  %704 = vmatpush1.msra.mxu1 %v534_v61  ;;  %s1536_s22 = sld [smem:[#allocation5 + %s356_s15]]  ;;  %s380_s15 = sadd.s32 15, %s1472_s28 }
  0x71   : > { %v303_v5 = vld [vmem:[%s302_s8] sm:$0x1]  ;;  %299 = vst [vmem:[#allocation3 + $0x4] sm:$0x1] %v298_v4  ;;  %616 = vmatprep.subr.mxu0 %v529_v1  ;;  %705 = vmatprep.subr.mxu1 %v531_v2  ;;  %s364_s8 = sadd.s32 13, %s1472_s28  ;;  %s388_s13 = sadd.s32 16, %s1472_s28 }
  0x72   : > { %304 = vst [vmem:[#allocation2 + $0x5] sm:$0x1] %v303_v5  ;;  %v306_v8 = vld [vmem:[%s305_s27] sm:$0x1]  ;;  %617 = vmatpush1.msra.mxu0 %v528_v6  ;;  %706 = vmatpush1.msra.mxu1 %v530_v7  ;;  %s372_s27 = sadd.s32 14, %s1472_s28  ;;  %s365_s10 = sld [smem:[#allocation5 + %s364_s8]] }
  0x73   : > { %v311_v9 = vld [vmem:[%s310_s7] sm:$0x1]  ;;  %307 = vst [vmem:[#allocation3 + $0x5] sm:$0x1] %v306_v8  ;;  %618 = vmatprep.subr.mxu0 %v525_v14  ;;  %652 = vmatprep.mubr.f32.mxu0 %v1324_v25  ;;  %s373_s7 = sld [smem:[#allocation5 + %s372_s27]] }
  0x74   : > { %v314_v10 = vld [vmem:[%s313_s11] sm:$0x1]  ;;  %312 = vst [vmem:[#allocation2 + $0x6] sm:$0x1] %v311_v9  ;;  %619 = vmatpush1.msra.mxu0 %v524_v16  ;;  %741 = vmatprep.mubr.f32.mxu1 %v1324_v25  ;;  %s1545_s11 = sld [smem:[#allocation5 + %s380_s15]] }
  0x75   : > { %315 = vst [vmem:[#allocation3 + $0x6] sm:$0x1] %v314_v10  ;;  %v319_v11 = vld [vmem:[%s318_s12] sm:$0x1]  ;;  %s396_s12 = sadd.s32 17, %s1472_s28 }
  0x76   : > { %v322_v12 = vld [vmem:[%s321_s29] sm:$0x1]  ;;  %320 = vst [vmem:[#allocation2 + $0x7] sm:$0x1] %v319_v11  ;;  %s1548_s29 = sld [smem:[#allocation5 + %s388_s13]]  ;;  %s420_s13 = sadd.s32 20, %s1472_s28 }
  0x77   : > { %v327_v13 = vld [vmem:[%s326_s18] sm:$0x1]  ;;  %323 = vst [vmem:[#allocation3 + $0x7] sm:$0x1] %v322_v12  ;;  %s404_s18 = sadd.s32 18, %s1472_s28 }
  0x78   : > { %v527_v15 = vld [vmem:[#allocation9 + $0x18] sm:$0xff]  ;;  %328 = vst [vmem:[#allocation2 + $0x8] sm:$0x1] %v327_v13 }
  0x79   : > { %v330_v18 = vld [vmem:[%s329_s14] sm:$0x1]  ;;  %707 = vmatprep.subr.mxu1 %v527_v15  ;;  %s358_s14 = scalar_lea.vmem [#allocation12], %s1536_s22 }
  0x7a   : > { %v335_v19 = vld [vmem:[%s334_s16] sm:$0x1]  ;;  %331 = vst [vmem:[#allocation3 + $0x8] sm:$0x1] %v330_v18  ;;  %708 = vmatpush1.msra.mxu1 %v526_v17  ;;  %s361_s16 = scalar_lea.vmem [#allocation11], %s1536_s22  ;;  %s377_s22 = scalar_lea.vmem [#allocation11], %s373_s7 }
  0x7b   : > { %336 = vst [vmem:[#allocation2 + $0x9] sm:$0x1] %v335_v19  ;;  %v338_v20 = vld [vmem:[%s337_s19] sm:$0x1]  ;;  %s1555_s19 = sld [smem:[#allocation5 + %s396_s12]]  ;;  %s382_s8 = scalar_lea.vmem [#allocation12], %s1545_s11 }
  0x7c   : > { %v343_v21 = vld [vmem:[%s342_s20] sm:$0x1]  ;;  %339 = vst [vmem:[#allocation3 + $0x9] sm:$0x1] %v338_v20  ;;  %s412_s20 = sadd.s32 19, %s1472_s28  ;;  %s385_s27 = scalar_lea.vmem [#allocation11], %s1545_s11 }
  0x7d   : > { %344 = vst [vmem:[#allocation2 + $0xa] sm:$0x1] %v343_v21  ;;  %v346_v22 = vld [vmem:[%s345_s21] sm:$0x1]  ;;  %v516_v26 = vld [vmem:[#allocation2] sm:$0xff]  ;;  %s366_s21 = scalar_lea.vmem [#allocation12], %s365_s10  ;;  %v784_v21 = vlaneseq }
  0x7e   : > { %v351_v23 = vld [vmem:[%s350_s30] sm:$0x1]  ;;  %347 = vst [vmem:[#allocation3 + $0xa] sm:$0x1] %v346_v22  ;;  %653 = vmatmul.mubr.f32.vlgmr.msra.gmra.mxu0 %v516_v26  ;;  %742 = vmatmul.mubr.f32.vlgmr.msra.gmra.mxu1 %v516_v26  ;;  %s369_s30 = scalar_lea.vmem [#allocation11], %s365_s10  ;;  %s390_s10 = scalar_lea.vmem [#allocation12], %s1548_s29 }
  0x7f   : > { %352 = vst [vmem:[#allocation2 + $0xb] sm:$0x1] %v351_v23  ;;  %v354_v24 = vld [vmem:[%s353_s23] sm:$0x1]  ;;  %658 = vmatprep.mubr.f32.mxu0 %v1324_v25  ;;  %747 = vmatprep.mubr.f32.mxu1 %v1324_v25  ;;  %s374_s23 = scalar_lea.vmem [#allocation12], %s373_s7  ;;  %s393_s15 = scalar_lea.vmem [#allocation11], %s1548_s29 }
  0x80   : > { %355 = vst [vmem:[#allocation3 + $0xb] sm:$0x1] %v354_v24  ;;  %v359_v27 = vld [vmem:[%s358_s14] sm:$0x1]  ;;  %s405_s7 = sld [smem:[#allocation5 + %s404_s18]]  ;;  %s452_s18 = sadd.s32 24, %s1472_s28 }
  0x81   : > { %v362_v28 = vld [vmem:[%s361_s16] sm:$0x1]  ;;  %360 = vst [vmem:[#allocation2 + $0xc] sm:$0x1] %v359_v27  ;;  %s398_s12 = scalar_lea.vmem [#allocation12], %s1555_s19  ;;  %s401_s11 = scalar_lea.vmem [#allocation11], %s1555_s19 }
  0x82   : > { %363 = vst [vmem:[#allocation3 + $0xc] sm:$0x1] %v362_v28  ;;  %v367_v29 = vld [vmem:[%s366_s21] sm:$0x1]  ;;  %s413_s14 = sld [smem:[#allocation5 + %s412_s20]]  ;;  %s428_s16 = sadd.s32 21, %s1472_s28 }
  0x83   : > { %v370_v30 = vld [vmem:[%s369_s30] sm:$0x1]  ;;  %368 = vst [vmem:[#allocation2 + $0xd] sm:$0x1] %v367_v29  ;;  %s421_s21 = sld [smem:[#allocation5 + %s420_s13]]  ;;  %s436_s30 = sadd.s32 22, %s1472_s28 }
  0x84   : > { %371 = vst [vmem:[#allocation3 + $0xd] sm:$0x1] %v370_v30  ;;  %v375_v31 = vld [vmem:[%s374_s23] sm:$0x1]  ;;  %s1571_s29 = sld [smem:[#allocation5 + %s428_s16]]  ;;  %s444_s23 = sadd.s32 23, %s1472_s28 }
  0x85   : > { %v378_v32 = vld [vmem:[%s377_s22] sm:$0x1]  ;;  %376 = vst [vmem:[#allocation2 + $0xe] sm:$0x1] %v375_v31  ;;  %s1574_s22 = sld [smem:[#allocation5 + %s436_s30]]  ;;  %v785_v26 = vshrl.u32 %v784_v21, 7 }
  0x86   : > { %379 = vst [vmem:[#allocation3 + $0xe] sm:$0x1] %v378_v32  ;;  %v383_v33 = vld [vmem:[%s382_s8] sm:$0x1]  ;;  %s406_s8 = scalar_lea.vmem [#allocation12], %s405_s7  ;;  %s1577_s19 = sld [smem:[#allocation5 + %s444_s23]] }
  0x87   : > { %v386_v34 = vld [vmem:[%s385_s27] sm:$0x1]  ;;  %384 = vst [vmem:[#allocation2 + $0xf] sm:$0x1] %v383_v33  ;;  %s409_s27 = scalar_lea.vmem [#allocation11], %s405_s7  ;;  %s453_s16 = sld [smem:[#allocation5 + %s452_s18]] }
  0x88   : > { %387 = vst [vmem:[#allocation3 + $0xf] sm:$0x1] %v386_v34  ;;  %v391_v35 = vld [vmem:[%s390_s10] sm:$0x1]  ;;  %s414_s20 = scalar_lea.vmem [#allocation12], %s413_s14  ;;  %s417_s10 = scalar_lea.vmem [#allocation11], %s413_s14 }
  0x89   : > { %v394_v36 = vld [vmem:[%s393_s15] sm:$0x1]  ;;  %392 = vst [vmem:[#allocation2 + $0x10] sm:$0x1] %v391_v35  ;;  %s422_s15 = scalar_lea.vmem [#allocation12], %s421_s21  ;;  %s425_s7 = scalar_lea.vmem [#allocation11], %s421_s21 }
  0x8a   : > { %395 = vst [vmem:[#allocation3 + $0x10] sm:$0x1] %v394_v36  ;;  %v399_v37 = vld [vmem:[%s398_s12] sm:$0x1]  ;;  %s430_s13 = scalar_lea.vmem [#allocation12], %s1571_s29  ;;  %s433_s12 = scalar_lea.vmem [#allocation11], %s1571_s29 }
  0x8b   : > { %v402_v38 = vld [vmem:[%s401_s11] sm:$0x1]  ;;  %400 = vst [vmem:[#allocation2 + $0x11] sm:$0x1] %v399_v37  ;;  %s438_s11 = scalar_lea.vmem [#allocation12], %s1574_s22  ;;  %s441_s14 = scalar_lea.vmem [#allocation11], %s1574_s22 }
  0x8c   : > { %403 = vst [vmem:[#allocation3 + $0x11] sm:$0x1] %v402_v38  ;;  %v407_v40 = vld [vmem:[%s406_s8] sm:$0x1]  ;;  %s460_s21 = sadd.s32 25, %s1472_s28  ;;  %s446_s30 = scalar_lea.vmem [#allocation12], %s1577_s19 }
  0x8d   : > { %v410_v41 = vld [vmem:[%s409_s27] sm:$0x1]  ;;  %408 = vst [vmem:[#allocation2 + $0x12] sm:$0x1] %v407_v40  ;;  %s449_s23 = scalar_lea.vmem [#allocation11], %s1577_s19  ;;  %s461_s29 = sld [smem:[#allocation5 + %s460_s21]] }
  0x8e   : > { %v517_v39 = vld [vmem:[#allocation2 + $0x8] sm:$0xff]  ;;  %411 = vst [vmem:[#allocation3 + $0x12] sm:$0x1] %v410_v41  ;;  %v415_v42 = vld [vmem:[%s414_s20] sm:$0x1]  ;;  %s468_s8 = sadd.s32 26, %s1472_s28 }
  0x8f   : > { %659 = vmatmul.mubr.f32.gmra.mxu0 %v517_v39  ;;  %748 = vmatmul.mubr.f32.gmra.mxu1 %v517_v39  ;;  %v418_v43 = vld [vmem:[%s417_s10] sm:$0x1]  ;;  %416 = vst [vmem:[#allocation2 + $0x13] sm:$0x1] %v415_v42  ;;  %s469_s27 = sld [smem:[#allocation5 + %s468_s8]]  ;;  %s476_s20 = sadd.s32 27, %s1472_s28 }
  0x90   : > { %664 = vmatprep.mubr.f32.mxu0 %v1324_v25  ;;  %753 = vmatprep.mubr.f32.mxu1 %v1324_v25  ;;  %419 = vst [vmem:[#allocation3 + $0x13] sm:$0x1] %v418_v43  ;;  %v423_v44 = vld [vmem:[%s422_s15] sm:$0x1]  ;;  %s1592_s22 = sld [smem:[#allocation5 + %s476_s20]]  ;;  %s484_s10 = sadd.s32 28, %s1472_s28 }
  0x91   : > { %v426_v45 = vld [vmem:[%s425_s7] sm:$0x1]  ;;  %424 = vst [vmem:[#allocation2 + $0x14] sm:$0x1] %v423_v44  ;;  %s1595_s15 = sld [smem:[#allocation5 + %s484_s10]]  ;;  %s492_s18 = sadd.s32 29, %s1472_s28 }
  0x92   : > { %427 = vst [vmem:[#allocation3 + $0x14] sm:$0x1] %v426_v45  ;;  %v431_v46 = vld [vmem:[%s430_s13] sm:$0x1]  ;;  %s454_s7 = scalar_lea.vmem [#allocation12], %s453_s16  ;;  %s457_s13 = scalar_lea.vmem [#allocation11], %s453_s16 }
  0x93   : > { %v434_v47 = vld [vmem:[%s433_s12] sm:$0x1]  ;;  %432 = vst [vmem:[#allocation2 + $0x15] sm:$0x1] %v431_v46  ;;  %s1598_s12 = sld [smem:[#allocation5 + %s492_s18]]  ;;  %s500_s19 = sadd.s32 30, %s1472_s28 }
  0x94   : > { %435 = vst [vmem:[#allocation3 + $0x15] sm:$0x1] %v434_v47  ;;  %v439_v48 = vld [vmem:[%s438_s11] sm:$0x1]  ;;  %s462_s11 = scalar_lea.vmem [#allocation12], %s461_s29  ;;  %s501_s8 = sld [smem:[#allocation5 + %s500_s19]] }
  0x95   : > { %v442_v49 = vld [vmem:[%s441_s14] sm:$0x1]  ;;  %440 = vst [vmem:[#allocation2 + $0x16] sm:$0x1] %v439_v48  ;;  %s465_s14 = scalar_lea.vmem [#allocation11], %s461_s29  ;;  %s470_s21 = scalar_lea.vmem [#allocation12], %s469_s27 }
  0x96   : > { %443 = vst [vmem:[#allocation3 + $0x16] sm:$0x1] %v442_v49  ;;  %v447_v50 = vld [vmem:[%s446_s30] sm:$0x1]  ;;  %s473_s30 = scalar_lea.vmem [#allocation11], %s469_s27  ;;  %s478_s16 = scalar_lea.vmem [#allocation12], %s1592_s22 }
  0x97   : > { %v450_v51 = vld [vmem:[%s449_s23] sm:$0x1]  ;;  %448 = vst [vmem:[#allocation2 + $0x17] sm:$0x1] %v447_v50  ;;  %s481_s23 = scalar_lea.vmem [#allocation11], %s1592_s22  ;;  %s486_s29 = scalar_lea.vmem [#allocation12], %s1595_s15 }
  0x98   : > { %451 = vst [vmem:[#allocation3 + $0x17] sm:$0x1] %v450_v51  ;;  %v455_v52 = vld [vmem:[%s454_s7] sm:$0x1]  ;;  %s489_s27 = scalar_lea.vmem [#allocation11], %s1595_s15  ;;  %s508_s18 = sadd.s32 31, %s1472_s28 }
  0x99   : > { %v458_v53 = vld [vmem:[%s457_s13] sm:$0x1]  ;;  %456 = vst [vmem:[#allocation2 + $0x18] sm:$0x1] %v455_v52  ;;  %s494_s20 = scalar_lea.vmem [#allocation12], %s1598_s12  ;;  %s497_s10 = scalar_lea.vmem [#allocation11], %s1598_s12 }
  0x9a   : > { %459 = vst [vmem:[#allocation3 + $0x18] sm:$0x1] %v458_v53  ;;  %v463_v54 = vld [vmem:[%s462_s11] sm:$0x1]  ;;  %s509_s7 = sld [smem:[#allocation5 + %s508_s18]]  ;;  %s502_s13 = scalar_lea.vmem [#allocation12], %s501_s8 }
  0x9b   : > { %v466_v55 = vld [vmem:[%s465_s14] sm:$0x1]  ;;  %464 = vst [vmem:[#allocation2 + $0x19] sm:$0x1] %v463_v54  ;;  %s505_s22 = scalar_lea.vmem [#allocation11], %s501_s8  ;;  %v786_v32 = vsub.s32 0, %v785_v26 }
  0x9c   : > { %467 = vst [vmem:[#allocation3 + $0x19] sm:$0x1] %v466_v55  ;;  %v471_v57 = vld [vmem:[%s470_s21] sm:$0x1]  ;;  %v766_v36 = vld [vmem:[%s1459_s24] sm:$0xff]  ;;  %v790_v50 = vsub.s32 1, %v785_v26 }
  0x9d   : > { %v474_v58 = vld [vmem:[%s473_s30] sm:$0x1]  ;;  %472 = vst [vmem:[#allocation2 + $0x1a] sm:$0x1] %v471_v57  ;;  %v767_v52 = vld [vmem:[%s1459_s24 + $0x8] sm:$0xff]  ;;  %s1325_s21 = smov [#allocation11]  }
  0x9e   : > { %v518_v56 = vld [vmem:[#allocation2 + $0x10] sm:$0xff]  ;;  %475 = vst [vmem:[#allocation3 + $0x1a] sm:$0x1] %v474_v58  ;;  %v479_v59 = vld [vmem:[%s478_s16] sm:$0x1]  ;;  %s877_s30 = sshll.u32 %s1325_s21, 4  ;;  %s878_s30 = int_to_ptr.vmem [resolvable:$true] %s877_s30 }
  0x9f   : > { %665 = vmatmul.mubr.f32.gmra.mxu0 %v518_v56  ;;  %754 = vmatmul.mubr.f32.gmra.mxu1 %v518_v56  ;;  %480 = vst [vmem:[#allocation2 + $0x1b] sm:$0x1] %v479_v59  ;;  %v482_v60 = vld [vmem:[%s481_s23] sm:$0x1]  ;;  %s1220_s23 = scalar_lea.vmem %s878_s30, 512  ;;  %p1227_p10 = scmp.lt.s32.totalorder %s878_s30, %s878_s30 }
  0xa0   : > { %670 = vmatprep.mubr.f32.mxu0 %v1324_v25  ;;  %759 = vmatprep.mubr.f32.mxu1 %v1324_v25  ;;  %v487_v61 = vld [vmem:[%s486_s29] sm:$0x1]  ;;  %483 = vst [vmem:[#allocation3 + $0x1b] sm:$0x1] %v482_v60  ;;  %s510_s19 = scalar_lea.vmem [#allocation12], %s509_s7  ;;  %s513_s11 = scalar_lea.vmem [#allocation11], %s509_s7 }
  0xa1   : > { %488 = vst [vmem:[#allocation2 + $0x1c] sm:$0x1] %v487_v61  ;;  %v490_v62 = vld [vmem:[%s489_s27] sm:$0x1]  ;;  %p1221_p0 = scmp.ne.s32.totalorder %s878_s30, %s1220_s23  ;;  %p1228_p11 = scmp.lt.s32.totalorder %s1220_s23, %s1220_s23 }
  0xa2   : > { %491 = vst [vmem:[#allocation3 + $0x1c] sm:$0x1] %v490_v62  ;;  %v495_v63 = vld [vmem:[%s494_s20] sm:$0x1] }
  0xa3   : > { %v498_v0 = vld [vmem:[%s497_s10] sm:$0x1]  ;;  %496 = vst [vmem:[#allocation2 + $0x1d] sm:$0x1] %v495_v63  ;;  %p1222_p7 = pnand %p1221_p0, %p1084_p8  ;;  %p1229_p12 = por %p1228_p11, %p1227_p10 }
  0xa4   : > { %499 = vst [vmem:[#allocation3 + $0x1d] sm:$0x1] %v498_v0  ;;  %v503_v1 = vld [vmem:[%s502_s13] sm:$0x1]  ;;  %v794_v0 = vsub.s32 2, %v785_v26 }
  0xa5   : > { %v506_v2 = vld [vmem:[%s505_s22] sm:$0x1]  ;;  %504 = vst [vmem:[#allocation2 + $0x1e] sm:$0x1] %v503_v1  ;;  %p1223_p9 = pneg %p1222_p7 }
  0xa6   : > { %507 = vst [vmem:[#allocation3 + $0x1e] sm:$0x1] %v506_v2  ;;  %v511_v3 = vld [vmem:[%s510_s19] sm:$0x1]  ;;  %v768_v2 = vld [vmem:[%s1459_s24 + $0x10] sm:$0xff] }
  0xa7   : > { %v514_v4 = vld [vmem:[%s513_s11] sm:$0x1]  ;;  %512 = vst [vmem:[#allocation2 + $0x1f] sm:$0x1] %v511_v3  ;;  %p1230_p13 = pnand %p1229_p12, %p1223_p9 }
  0xa8   : > { %515 = vst [vmem:[#allocation3 + $0x1f] sm:$0x1] %v514_v4  ;;  %v1046_v13 = vld [vmem:[%s1665_s4] ss:$0 sm:$0xff] }
  0xa9   : > { %v769_v18 = vld [vmem:[%s1459_s24 + $0x18] sm:$0xff]  ;;  %s1051_s24 = sshll.u32 %s1386_s0, 3 }
  0xaa   : > { %v782_v33 = vld [vmem:[%s1664_s3] sm:$0x7]  ;;  %s867_s16 = scalar_lea.vmem [#allocation11], %s1051_s24 }
  0xab   : > { %v787_v39 = vrot.slane %v782_v33, %v786_v32  ;;  %v791_v57 = vrot.slane %v782_v33, %v790_v50  ;;  %v795_v4 = vrot.slane %v782_v33, %v794_v0 }
  0xae   : > { %v519_v5 = vld [vmem:[#allocation2 + $0x18] sm:$0xff] }
  0xaf   : > { %671 = vmatmul.mubr.f32.gmra.mxu0 %v519_v5  ;;  %760 = vmatmul.mubr.f32.gmra.mxu1 %v519_v5  ;;  %v523_v21 = vld [vmem:[#allocation3 + $0x18] sm:$0xff] }
 0x13e   : > { %v743_v6 = vpop.f32.mrf.mxu1  ;;  %v654_v9 = vpop.f32.mrf.mxu0 }
 0x140   : > { %v745_v7 = vpop.f32.mrf.mxu1  ;;  %v656_v11 = vpop.f32.mrf.mxu0 }
 0x141   : > { %v822_v17 = vadd.f32 %v1046_v13, %v745_v7 }
 0x143   : > { %v823_v23 = vadd.f32 %v822_v17, %v769_v18 }
 0x145   : > { %v1047_v28 = vmul.f32 -1.442695, %v823_v23 }
 0x14f   : > { %v749_v8 = vpop.f32.mrf.mxu1  ;;  %v660_v14 = vpop.f32.mrf.mxu0 }
 0x150   : > { %v770_v31 = vadd.f32 %v660_v14, %v654_v9  ;;  %v772_v55 = vadd.f32 %v749_v8, %v743_v6 }
 0x151   : > { %v751_v10 = vpop.f32.mrf.mxu1  ;;  %v662_v19 = vpop.f32.mrf.mxu0 }
 0x152   : > { %v832_v16 = vadd.f32 %v1046_v13, %v751_v10  ;;  %v771_v42 = vadd.f32 %v662_v19, %v656_v11 }
 0x154   : > { %v833_v22 = vadd.f32 %v832_v16, %v769_v18  ;;  %v522_v16 = vld [vmem:[#allocation3 + $0x10] sm:$0xff] }
 0x156   : > { %v1048_v27 = vmul.f32 -1.442695, %v833_v22 }
 0x158   : > { %1130 = vpow2.f32 %v1048_v27 }
 0x159   : > { %1132 = vpow2.f32 %v1047_v28 }
 0x15f   : > { %v755_v12 = vpop.f32.mrf.mxu1  ;;  %v666_v24 = vpop.f32.mrf.mxu0 }
 0x160   : > { %v773_v34 = vadd.f32 %v770_v31, %v666_v24  ;;  %v775_v60 = vadd.f32 %v772_v55, %v755_v12  ;;  %v521_v12 = vld [vmem:[#allocation3 + $0x8] sm:$0xff] }
 0x161   : > { %v757_v15 = vpop.f32.mrf.mxu1  ;;  %v668_v29 = vpop.f32.mrf.mxu0 }
 0x162   : > { %v842_v20 = vadd.f32 %v1046_v13, %v757_v15  ;;  %v774_v46 = vadd.f32 %v771_v42, %v668_v29  ;;  %v520_v15 = vld [vmem:[#allocation3] sm:$0xff] }
 0x164   : > { %v843_v25 = vadd.f32 %v842_v20, %v769_v18 }
 0x165   : > { %v1131_v53 = vpop.eup %1130 }
 0x166   : > { %v1049_v30 = vmul.f32 -1.442695, %v843_v25  ;;  %v1133_v54 = vpop.eup %1132  ;;  %v837_v59 = vadd.f32 1.0, %v1131_v53 }
 0x167   : > { %v827_v61 = vadd.f32 1.0, %v1133_v54 }
 0x168   : > { %1134 = vpow2.f32 %v1049_v30 }
 0x16f   : > { %v672_v35 = vpop.f32.mrf.mxu0  ;;  %v761_v37 = vpop.f32.mrf.mxu1 }
 0x170   : > { %v776_v38 = vadd.f32 %v773_v34, %v672_v35  ;;  %v778_v63 = vadd.f32 %v775_v60, %v761_v37 }
 0x171   : > { %v763_v40 = vpop.f32.mrf.mxu1  ;;  %v674_v45 = vpop.f32.mrf.mxu0 }
 0x172   : > { %v779_v41 = vadd.f32 %v776_v38, %v766_v36  ;;  %v852_v43 = vadd.f32 %v1046_v13, %v763_v40  ;;  %v777_v49 = vadd.f32 %v774_v46, %v674_v45  ;;  %v781_v3 = vadd.f32 %v778_v63, %v768_v2 }
 0x174   : > { %v799_v44 = vadd.f32 %v787_v39, %v779_v41  ;;  %v853_v47 = vadd.f32 %v852_v43, %v769_v18  ;;  %v780_v56 = vadd.f32 %v777_v49, %v767_v52  ;;  %v801_v8 = vadd.f32 %v795_v4, %v781_v3 }
 0x175   : > { %v1135_v58 = vpop.eup %1134 }
 0x176   : > { %v1044_v48 = vmul.f32 -1.442695, %v799_v44  ;;  %v1050_v51 = vmul.f32 -1.442695, %v853_v47  ;;  %v847_v62 = vadd.f32 1.0, %v1135_v58  ;;  %v800_v1 = vadd.f32 %v791_v57, %v780_v56 }
 0x178   : > { %1136 = vpow2.f32 %v1044_v48  ;;  %v1045_v5 = vmul.f32 -1.442695, %v800_v1 }
 0x179   : > { %1138 = vpow2.f32 %v1050_v51 }
 0x17a   : > { %1140 = vrcp.f32 %v837_v59 }
 0x17b   : > { %1142 = vrcp.f32 %v827_v61 }
 0x17c   : > { %1144 = vrcp.f32 %v847_v62 }
 0x17d   : > { %1146 = vpow2.f32 %v1045_v5 }
 0x185   : > { %v1137_v7 = vpop.eup %1136 }
 0x186   : > { %v1139_v9 = vpop.eup %1138  ;;  %v805_v6 = vadd.f32 1.0, %v1137_v7 }
 0x187   : > { %v857_v10 = vadd.f32 1.0, %v1139_v9  ;;  %v1141_v11 = vpop.eup %1140 }
 0x188   : > { %1148 = vrcp.f32 %v805_v6  ;;  %v1143_v13 = vpop.eup %1142  ;;  %v840_v17 = vmul.f32 %v1141_v11, %v521_v12 }
 0x189   : > { %1150 = vrcp.f32 %v857_v10  ;;  %v1145_v14 = vpop.eup %1144  ;;  %v830_v18 = vmul.f32 %v1143_v13, %v520_v15 }
 0x18a   : > { %1152 = vtanh.f32 %v801_v8  ;;  %v850_v19 = vmul.f32 %v1145_v14, %v522_v16  ;;  %v1147_v20 = vpop.eup %1146 }
 0x18b   : > { %v841_v23 = vadd.f32 %v840_v17, %v830_v18  ;;  %v811_v28 = vadd.f32 1.0, %v1147_v20 }
 0x18d   : > { %v851_v25 = vadd.f32 %v850_v19, %v841_v23  ;;  %1154 = vrcp.f32 %v811_v28 }
 0x195   : > { %v1149_v22 = vpop.eup %1148 }
 0x196   : > { %v1151_v24 = vpop.eup %1150 }
 0x197   : > { %v860_v26 = vmul.f32 %v1151_v24, %v523_v21  ;;  %v1153_v27 = vpop.eup %1152 }
 0x198   : > { %v862_v29 = vmul.f32 %v1153_v27, %v1149_v22 }
 0x199   : > { %v861_v30 = vadd.f32 %v860_v26, %v851_v25 }
 0x19b   : > { %v863_v31 = vadd.f32 %v862_v29, %v861_v30 }
 0x19d   : > { %1156 = vtanh.f32 %v863_v31  ;;  %868 = vst [vmem:[%s867_s16] sm:$0xff] %v863_v31 }
 0x19e   : > { %1233 = shalt.err (!%p1230_p13)
}
 0x19f   : > { %s1326_s29 = smov 128   ;;  %s1327_s8 = smov 8   ;;  %v1155_v32 = vpop.eup %1154 }
 0x1a0   : > { %1066 = dma.vmem_to_hbm [thread:$0]  (%p1084_p8), %s878_s30, 512, %s1666_s5, [#allocation8], %s1326_s29, %s1326_s29, %s1327_s8  }
 0x1a1   : > { %s1328_s10 = smov [#allocation12]   ;;  %s869_s7 = scalar_lea.vmem [#allocation12], %s1051_s24 }
 0x1a2   : > { %s890_s18 = sshll.u32 %s1328_s10, 4  ;;  %s891_s18 = int_to_ptr.vmem [resolvable:$true] %s890_s18 }
 0x1a3   : > { %s1244_s13 = scalar_lea.vmem %s891_s18, 512  ;;  %p1251_p1 = scmp.lt.s32.totalorder %s891_s18, %s891_s18 }
 0x1a4   : > { %p1245_p2 = scmp.ne.s32.totalorder %s891_s18, %s1244_s13  ;;  %p1252_p5 = scmp.lt.s32.totalorder %s1244_s13, %s1244_s13 }
 0x1a6   : > { %p1246_p3 = pnand %p1245_p2, %p1084_p8  ;;  %p1253_p6 = por %p1252_p5, %p1251_p1 }
 0x1a8   : > { %p1247_p4 = pneg %p1246_p3 }
 0x1aa   : > { %v1157_v33 = vpop.eup %1156  ;;  %p1254_p0 = pnand %p1253_p6, %p1247_p4 }
 0x1ab   : > { %v865_v34 = vmul.f32 %v1157_v33, %v1155_v32 }
 0x1ad   : > { %870 = vst [vmem:[%s869_s7] sm:$0xff] %v865_v34 }
 0x1ae   : > { %1257 = shalt.err (!%p1254_p0)
}
 0x1af   : > { %1068 = dma.vmem_to_hbm [thread:$0]  (%p1084_p8), %s891_s18, 512, %s1667_s6, [#allocation13], %s1326_s29, %s1326_s29, %s1327_s8  }
 0x1b0   : > { %1295 = dma.done.wait (%p1084_p8), [#allocation8], 512  }
 0x1b1   : > { %1297 = vsyncadd (%p1084_p8), [#allocation8], 4294966784 }
 0x1b2   : > { %1299 = dma.done.wait (%p1084_p8), [#allocation13], 512  }
 0x1b3   : > { %1301 = vsyncadd (%p1084_p8), [#allocation13], 4294966784 }
 0x1b4 PF: > { %p24_p7 = scmp.ge.s32.totalorder %s1412_s9, 5   ;;  %s1680_s24 = smov %s1308_s25 }
 0x1b5   : > { %s1681_s25 = smov %s1312_s26  ;;  %s1682_s26 = smov %s1429_s17 }
 0x1b6   : > { %s1683_s27 = smov %s1412_s9  ;;  %26 = sbr.rel (!%p24_p7) target bundleno = 11 (0xb), region = 155 }
 0x1bb   :  { %910 = vsyncpa [#allocation7], 1 }
 0x1bc   :  { %912 = vsyncpa [#allocation7 + $0x1], 1 }
 0x1bd   :  { %913 = vsyncpa [#allocation10], 1 }
 0x1be   :  { %914 = vsyncpa [#allocation8], 1 }
 0x1bf   :  { %916 = vsyncpa [#allocation8 + $0x1], 1 }
 0x1c0   :  { %917 = vsyncpa [#allocation13], 1 }

</bundles_post_ra>
